<compile_context>
chip_gen: v7x
topology: tpu7x:2x2x1
jax: 0.10.0
libtpu: 0.0.40
codegen_flags: <defaults>
</compile_context>

<pallas_src>
import numpy as np
import jax
import jax.numpy as jnp
from jax.experimental import pallas as pl
from jax.experimental.pallas import tpu as pltpu

# -----------------------------------------------------------------------------
# Host-side construction of the fixed 4-wire quantum circuit (16x16 unitary).
# Wire 0 is the most-significant bit of the 16-dim state index.
# -----------------------------------------------------------------------------
N_WIRES = 4
DIM = 2 ** N_WIRES
EPS = 1e-12
RATES = (1, 3, 5, 7)
# Distinct vertical offsets d = (ky-1)*rate of the dilated 3x3 taps.
D_OFFSETS = tuple(sorted({(ky - 1) * r for r in RATES for ky in range(3)}))


def _rx(t):
    c, s = np.cos(t / 2), np.sin(t / 2)
    return np.array([[c, -1j * s], [-1j * s, c]], dtype=np.complex128)


def _ry(t):
    c, s = np.cos(t / 2), np.sin(t / 2)
    return np.array([[c, -s], [s, c]], dtype=np.complex128)


def _rz(t):
    return np.array([[np.exp(-1j * t / 2), 0], [0, np.exp(1j * t / 2)]],
                    dtype=np.complex128)


_H = (1.0 / np.sqrt(2.0)) * np.array([[1, 1], [1, -1]], dtype=np.complex128)
_SX = 0.5 * np.array([[1 + 1j, 1 - 1j], [1 - 1j, 1 + 1j]], dtype=np.complex128)
_X = np.array([[0, 1], [1, 0]], dtype=np.complex128)


def _controlled(g):
    cu = np.eye(4, dtype=np.complex128)
    cu[2:, 2:] = g
    return cu


def _embed(gate, wires):
    """Embed a 2^k x 2^k gate acting on `wires` into the 16x16 space."""
    wires = [int(w) for w in wires]
    U = np.zeros((DIM, DIM), dtype=np.complex128)
    for i in range(DIM):
        bi = [(i >> (N_WIRES - 1 - w)) & 1 for w in range(N_WIRES)]
        for j in range(DIM):
            bj = [(j >> (N_WIRES - 1 - w)) & 1 for w in range(N_WIRES)]
            if any(bi[w] != bj[w] for w in range(N_WIRES) if w not in wires):
                continue
            si = sj = 0
            for w in wires:
                si = (si << 1) | bi[w]
                sj = (sj << 1) | bj[w]
            U[i, j] = gate[si, sj]
    return U


def build_circuit_unitary():
    rs = np.random.RandomState(0)
    U = np.eye(DIM, dtype=np.complex128)

    # RandomLayer(n_ops=50) emulation: deterministic pseudo-random sequence of
    # parameterized {RX,RY,RZ,CRX,CRY} gates (params fixed at init in PyTorch).
    for _ in range(50):
        theta = rs.uniform(0.0, 2.0 * np.pi)
        if rs.rand() < 0.6:
            g = [_rx, _ry, _rz][rs.randint(3)](theta)
            wires = [rs.randint(N_WIRES)]
        else:
            base = _rx(theta) if rs.rand() < 0.5 else _ry(theta)
            g = _controlled(base)
            wires = rs.choice(N_WIRES, 2, replace=False).tolist()
        U = _embed(g, wires) @ U

    # Fixed trailing gates of QLayer.forward.
    U = _embed(_rx(0.3), [0]) @ U                    # rx0 on wire 0
    U = _embed(_ry(0.7), [1]) @ U                    # ry0 on wire 1
    U = _embed(_rz(1.1), [3]) @ U                    # rz0 on wire 3
    U = _embed(_controlled(_rx(0.5)), [0, 2]) @ U    # crx0 on [0, 2]
    U = _embed(_H, [3]) @ U                          # hadamard wire 3
    U = _embed(_SX, [2]) @ U                         # sx wire 2
    U = _embed(_controlled(_X), [3, 0]) @ U          # cnot [3, 0]
    assert np.allclose(U @ U.conj().T, np.eye(DIM), atol=1e-10)
    return U


def build_zmat():
    # zmat[i, k] = <i| Z_k |i>, wire 0 = MSB.
    z = np.zeros((DIM, N_WIRES), dtype=np.float32)
    for i in range(DIM):
        for k in range(N_WIRES):
            z[i, k] = 1.0 - 2.0 * ((i >> (N_WIRES - 1 - k)) & 1)
    return z


# -----------------------------------------------------------------------------
# Pallas kernel.  One batch tile per grid step; everything lives in the
# lane-dense (rows, W*features) layout.
# -----------------------------------------------------------------------------
def _make_kernel(Bt, H, W, C, offsets):
    WC = W * C
    f32, bf16 = jnp.float32, jnp.bfloat16

    def kernel(x_ref, wcat_ref, bfold_ref, ubd_ref, wcomb_ref, incb_ref,
               o_ref, xcat_ref):
        # ---- assemble lane-aligned stacked shifted rows ----------------------
        # slot k, row b*H + r  <-  x[b, r + d_k, :]  (zero outside == conv pad).
        # Full zero-fill every step (cheap; scratch is per-core, so do not gate
        # on program_id == 0 under a "parallel" grid axis).
        xcat_ref[...] = jnp.zeros(xcat_ref.shape, xcat_ref.dtype)
        for b in range(Bt):
            base = b * H
            for k, d in enumerate(offsets):
                r0, r1 = max(0, -d), min(H, H - d)
                xcat_ref[base + r0:base + r1, k * WC:(k + 1) * WC] = (
                    x_ref[base + r0 + d:base + r1 + d, :])

        # ---- fused dilated-depthwise(3x3) + pointwise + concat + decrease ----
        # One long-K bf16 MXU matmul against the banded folded weights.
        v2 = jnp.dot(xcat_ref[...].astype(bf16), wcat_ref[...],
                     preferred_element_type=f32) + bfold_ref[...]   # (Bt*H, W*16)

        # ---- amplitude encoding + fixed circuit: psi = v2 @ [Re|Im](U^T) -----
        psi = jnp.dot(v2.astype(bf16), ubd_ref[...],
                      preferred_element_type=f32)                   # (Bt*H, W*32)
        psi2 = psi * psi

        # ---- PauliZ + repeat(1,4) + increase AND the per-pixel norm ----------
        # (||psi||^2 == ||v2||^2 by unitarity) in ONE block-diagonal matmul;
        # the column split at WC is a multiple of 128 -> lane-aligned slices.
        res = jnp.dot(psi2.astype(bf16), wcomb_ref[...],
                      preferred_element_type=f32)                   # (Bt*H, 2*W*C)
        t_out = res[:, :WC]
        norm = res[:, WC:]

        y = t_out * pl.reciprocal(norm + EPS, approx=True) + incb_ref[...]
        o_ref[...] = jax.nn.sigmoid(jax.nn.sigmoid(y))              # QFC + block

    return kernel


# -----------------------------------------------------------------------------
# Host-side weight folding (jnp, so the whole forward stays jittable).
# -----------------------------------------------------------------------------
def _fold_params(params, W, C):
    Cq = C // 4
    dw_w, dw_b = params["dw_w"], params["dw_b"]        # (4,3,3,C), (4,C)
    pw_w, pw_b = params["pw_w"], params["pw_b"]        # (4,C,Cq), (4,Cq)
    dec_w, dec_b = params["dec_w"], params["dec_b"]    # (C,16),   (1,16)
    inc_w, inc_b = params["inc_w"], params["inc_b"]    # (16,C),   (1,C)
    ut_r, ut_i, zmat = params["ut_r"], params["ut_i"], params["zmat"]

    # Fold pointwise + concat + decrease into per-scale (C,16) weights + bias.
    w_s, bfold = [], dec_b[0]
    for s in range(4):
        dec_slice = dec_w[s * Cq:(s + 1) * Cq]         # (Cq,16) — scale-major
        w_s.append(pw_w[s] @ dec_slice)                # (C,16)
        bfold = bfold + pw_b[s] @ dec_slice + dw_b[s] @ w_s[s]

    # Banded (W*C -> W*16) matrices: horizontal taps + pointwise + decrease
    # folded, grouped by vertical offset d; out-of-range taps dropped == zero
    # padding, so the kernel never needs a horizontally padded input.
    mats = []
    for d in D_OFFSETS:
        M = jnp.zeros((W * C, W * 16), jnp.float32)
        for s, rate in enumerate(RATES):
            for ky in range(3):
                if (ky - 1) * rate != d:
                    continue
                for kx in range(3):
                    shift = np.zeros((W, W), np.float32)
                    for w in range(W):
                        wsrc = w + (kx - 1) * rate
                        if 0 <= wsrc < W:
                            shift[wsrc, w] = 1.0
                    blk = dw_w[s, ky, kx][:, None] * w_s[s]          # (C,16)
                    M = M + jnp.einsum("uv,cm->ucvm", jnp.asarray(shift),
                                       blk).reshape(W * C, W * 16)
        mats.append(M)
    wcat = jnp.concatenate(mats, axis=0).astype(jnp.bfloat16)        # (9*W*C, W*16)

    eye_w = jnp.eye(W, dtype=jnp.float32)

    # Fixed circuit: per-pixel block-diagonal [Re|Im] of U^T.
    ut_cat = jnp.concatenate([ut_r, ut_i], axis=1)                   # (16,32)
    ubd = jnp.einsum("wv,ij->wivj", eye_w,
                     ut_cat).reshape(W * 16, W * 32).astype(jnp.bfloat16)

    # zmat + repeat(1,4) + increase folded into a (32,C) matrix; the norm
    # comes from an adjacent block-diagonal ones group (single matmul).
    inc_sum = inc_w[0:4] + inc_w[4:8] + inc_w[8:12] + inc_w[12:16]   # (4,C)
    w_post = zmat @ inc_sum                                          # (16,C)
    w_post2 = jnp.concatenate([w_post, w_post], axis=0)              # (32,C)
    wpbd = jnp.einsum("wv,jc->wjvc", eye_w, w_post2).reshape(W * 32, W * C)
    wnorm = jnp.einsum("wv,jc->wjvc", eye_w,
                       jnp.ones((32, C), jnp.float32)).reshape(W * 32, W * C)
    wcomb = jnp.concatenate([wpbd, wnorm], axis=1).astype(jnp.bfloat16)  # (W*32, 2*W*C)

    bfold_t = jnp.tile(bfold, W).reshape(1, W * 16).astype(jnp.float32)
    incb_t = jnp.tile(inc_b[0], W).reshape(1, W * C).astype(jnp.float32)
    return wcat, bfold_t, ubd, wcomb, incb_t


def _pick_batch_tile(B, H, WC, n_slots):
    # Fill the MXU rows (>= 256) per grid step when the batch allows; cap the
    # per-step footprint (input block + stacked scratch) at ~8 MiB.
    rows_target = 256
    bt = min(B, max(1, -(-rows_target // H)))
    per_image = H * WC * 4 * (n_slots + 4)
    bt = max(1, min(bt, (8 << 20) // max(per_image, 1), B))
    while B % bt:
        bt -= 1
    return bt


def multi_scale_quantum_block(x_nchw, params, batch_tile=None):
    """x_nchw: (B, C, H, W) float32  ->  (B, C, H, W) float32."""
    B, C, H, W = x_nchw.shape
    assert C % 4 == 0, "in_channels must be divisible by 4"
    WC = W * C
    NS = len(D_OFFSETS)

    # NCHW -> NHWC -> lane-dense row-stacked (B*H, W*C); no host-side padding.
    x2 = jnp.transpose(x_nchw, (0, 2, 3, 1)).reshape(B * H, WC)

    wcat, bfold_t, ubd, wcomb, incb_t = _fold_params(params, W, C)
    weights = [wcat, bfold_t, ubd, wcomb, incb_t]

    Bt = _pick_batch_tile(B, H, WC, NS) if batch_tile is None else batch_tile
    assert B % Bt == 0

    def full_spec(arr):
        nd = arr.ndim
        return pl.BlockSpec(arr.shape, lambda i, _nd=nd: (0,) * _nd)

    out = pl.pallas_call(
        _make_kernel(Bt, H, W, C, D_OFFSETS),
        out_shape=jax.ShapeDtypeStruct((B * H, WC), jnp.float32),
        grid=(B // Bt,),
        in_specs=[pl.BlockSpec((Bt * H, WC), lambda i: (i, 0))]
                 + [full_spec(w) for w in weights],
        out_specs=pl.BlockSpec((Bt * H, WC), lambda i: (i, 0)),
        scratch_shapes=[pltpu.VMEM((Bt * H, NS * WC), jnp.float32)],
        compiler_params=pltpu.CompilerParams(
            dimension_semantics=("parallel",)),
    )(x2, *weights)

    out = out.reshape(B, H, W, C)
    return jnp.transpose(out, (0, 3, 1, 2))             # back to NCHW


# -----------------------------------------------------------------------------
# Pure-JAX reference (unfolded math, mirrors the PyTorch module) for checking.
# -----------------------------------------------------------------------------
def reference(x_nchw, params):
    x = jnp.transpose(x_nchw, (0, 2, 3, 1))
    B, H, W, C = x.shape
    PAD = max(RATES)
    xp = jnp.pad(x, ((0, 0), (PAD, PAD), (PAD, PAD), (0, 0)))
    feats = []
    for s, rate in enumerate(RATES):
        acc = jnp.zeros((B, H, W, C), jnp.float32)
        for ky in range(3):
            for kx in range(3):
                dy = (ky - 1) * rate + PAD
                dx = (kx - 1) * rate + PAD
                acc = acc + xp[:, dy:dy + H, dx:dx + W, :] * params["dw_w"][s, ky, kx]
        acc = acc + params["dw_b"][s]
        feats.append(acc @ params["pw_w"][s] + params["pw_b"][s])
    cat = jnp.concatenate(feats, axis=-1)
    v = cat @ params["dec_w"] + params["dec_b"]
    psi_r = v @ params["ut_r"]
    psi_i = v @ params["ut_i"]
    norm2 = jnp.sum(v * v, axis=-1, keepdims=True)
    probs = (psi_r ** 2 + psi_i ** 2) / (norm2 + EPS)
    exps = probs @ params["zmat"]
    feat16 = jnp.concatenate([exps] * 4, axis=-1)
    y = feat16 @ params["inc_w"] + params["inc_b"]
    y = jax.nn.sigmoid(jax.nn.sigmoid(y))
    return jnp.transpose(y, (0, 3, 1, 2))


# -----------------------------------------------------------------------------
# Deterministic parameter init + run.
# -----------------------------------------------------------------------------
def make_params(in_channels, qm_channels=16):
    C = in_channels
    Cq = C // 4
    keys = jax.random.split(jax.random.PRNGKey(0), 8)
    params = {
        # DepthwiseSeparableConv x4 (dilations 1,3,5,7)
        "dw_w": (0.2 * jax.random.normal(keys[0], (4, 3, 3, C))).astype(jnp.float32),
        "dw_b": (0.05 * jax.random.normal(keys[1], (4, C))).astype(jnp.float32),
        "pw_w": (0.2 * jax.random.normal(keys[2], (4, C, Cq))).astype(jnp.float32),
        "pw_b": (0.05 * jax.random.normal(keys[3], (4, Cq))).astype(jnp.float32),
        # QFCModel.decrease / increase (1x1 convs)
        "dec_w": (0.2 * jax.random.normal(keys[4], (C, qm_channels))).astype(jnp.float32),
        "dec_b": (0.05 * jax.random.normal(keys[5], (1, qm_channels))).astype(jnp.float32),
        "inc_w": (0.2 * jax.random.normal(keys[6], (qm_channels, C))).astype(jnp.float32),
        "inc_b": (0.05 * jax.random.normal(keys[7], (1, C))).astype(jnp.float32),
    }
    # Fixed quantum circuit -> real/imag parts of U^T (so psi = v @ U^T).
    U = build_circuit_unitary()
    params["ut_r"] = jnp.asarray(np.real(U.T), dtype=jnp.float32)
    params["ut_i"] = jnp.asarray(np.imag(U.T), dtype=jnp.float32)
    params["zmat"] = jnp.asarray(build_zmat(), dtype=jnp.float32)
    return params


if __name__ == "__main__":
    B, C, H, W = 2, 8, 16, 16      # in_channels must be divisible by 4
    x = jax.random.normal(jax.random.PRNGKey(0), (B, C, H, W), dtype=jnp.float32)
    params = make_params(in_channels=C, qm_channels=16)

    fwd = jax.jit(multi_scale_quantum_block)
    out = jax.block_until_ready(fwd(x, params))

    ref = jax.block_until_ready(reference(x, params))
    assert out.shape == (B, C, H, W)
    np.testing.assert_allclose(np.asarray(out), np.asarray(ref), atol=1e-2, rtol=1e-2)

    print("KERNEL_OK")
</pallas_src>

<mosaic_0001>
module attributes {stable_mosaic.version = 11 : i64} {
  func.func @kernel(%arg0: i32, %arg1: memref<32x128xf32, #tpu.memory_space<vmem>>, %arg2: memref<1152x256xbf16, #tpu.memory_space<vmem>>, %arg3: memref<1x256xf32, #tpu.memory_space<vmem>>, %arg4: memref<256x512xbf16, #tpu.memory_space<vmem>>, %arg5: memref<512x256xbf16, #tpu.memory_space<vmem>>, %arg6: memref<1x128xf32, #tpu.memory_space<vmem>>, %arg7: memref<32x128xf32, #tpu.memory_space<vmem>>, %arg8: memref<32x1152xf32, #tpu.memory_space<vmem>>) attributes {dimension_semantics = [#tpu.dimension_semantics<parallel>], iteration_bounds = array<i64: 1>, scalar_prefetch = 0 : i64, scratch_operands = 1 : i64, tpu.core_type = #tpu.core_type<tc>, window_params = [{transform_indices = @transform_0, window_bounds = array<i64: 32, 128>}, {pipeline_mode = #tpu.pipeline_mode<synchronous>, transform_indices = @transform_1, window_bounds = array<i64: 1152, 256>}, {pipeline_mode = #tpu.pipeline_mode<synchronous>, transform_indices = @transform_2, window_bounds = array<i64: 1, 256>}, {pipeline_mode = #tpu.pipeline_mode<synchronous>, transform_indices = @transform_3, window_bounds = array<i64: 256, 512>}, {pipeline_mode = #tpu.pipeline_mode<synchronous>, transform_indices = @transform_4, window_bounds = array<i64: 512, 256>}, {pipeline_mode = #tpu.pipeline_mode<synchronous>, transform_indices = @transform_5, window_bounds = array<i64: 1, 128>}, {transform_indices = @transform_6, window_bounds = array<i64: 32, 128>}]} {
    %cst = arith.constant 0.000000e+00 : f32
    %0 = vector.broadcast %cst : f32 to vector<32x1152xf32>
    %c0 = arith.constant 0 : index
    %c0_0 = arith.constant 0 : index
    %1 = vector.load %arg8[%c0, %c0_0] : memref<32x1152xf32, #tpu.memory_space<vmem>>, vector<32x1152xf32>
    tpu.vector_store %arg8[%c0, %c0_0], %0 {strides = array<i32>} : memref<32x1152xf32, #tpu.memory_space<vmem>>, vector<32x1152xf32>,
    %c0_1 = arith.constant 0 : index
    %c0_2 = arith.constant 0 : index
    %2 = vector.load %arg1[%c0_1, %c0_2] : memref<32x128xf32, #tpu.memory_space<vmem>>, vector<9x128xf32>
    %c7 = arith.constant 7 : index
    %c0_3 = arith.constant 0 : index
    %3 = vector.load %arg8[%c7, %c0_3] : memref<32x1152xf32, #tpu.memory_space<vmem>>, vector<9x128xf32>
    tpu.vector_store %arg8[%c7, %c0_3], %2 {strides = array<i32>} : memref<32x1152xf32, #tpu.memory_space<vmem>>, vector<9x128xf32>,
    %c0_4 = arith.constant 0 : index
    %c0_5 = arith.constant 0 : index
    %4 = vector.load %arg1[%c0_4, %c0_5] : memref<32x128xf32, #tpu.memory_space<vmem>>, vector<11x128xf32>
    %c5 = arith.constant 5 : index
    %c128 = arith.constant 128 : index
    %5 = vector.load %arg8[%c5, %c128] : memref<32x1152xf32, #tpu.memory_space<vmem>>, vector<11x128xf32>
    tpu.vector_store %arg8[%c5, %c128], %4 {strides = array<i32>} : memref<32x1152xf32, #tpu.memory_space<vmem>>, vector<11x128xf32>,
    %c0_6 = arith.constant 0 : index
    %c0_7 = arith.constant 0 : index
    %6 = vector.load %arg1[%c0_6, %c0_7] : memref<32x128xf32, #tpu.memory_space<vmem>>, vector<13x128xf32>
    %c3 = arith.constant 3 : index
    %c256 = arith.constant 256 : index
    %7 = vector.load %arg8[%c3, %c256] : memref<32x1152xf32, #tpu.memory_space<vmem>>, vector<13x128xf32>
    tpu.vector_store %arg8[%c3, %c256], %6 {strides = array<i32>} : memref<32x1152xf32, #tpu.memory_space<vmem>>, vector<13x128xf32>,
    %c0_8 = arith.constant 0 : index
    %c0_9 = arith.constant 0 : index
    %8 = vector.load %arg1[%c0_8, %c0_9] : memref<32x128xf32, #tpu.memory_space<vmem>>, vector<15x128xf32>
    %c1 = arith.constant 1 : index
    %c384 = arith.constant 384 : index
    %9 = vector.load %arg8[%c1, %c384] : memref<32x1152xf32, #tpu.memory_space<vmem>>, vector<15x128xf32>
    tpu.vector_store %arg8[%c1, %c384], %8 {strides = array<i32>} : memref<32x1152xf32, #tpu.memory_space<vmem>>, vector<15x128xf32>,
    %c0_10 = arith.constant 0 : index
    %c0_11 = arith.constant 0 : index
    %10 = vector.load %arg1[%c0_10, %c0_11] : memref<32x128xf32, #tpu.memory_space<vmem>>, vector<16x128xf32>
    %c0_12 = arith.constant 0 : index
    %c512 = arith.constant 512 : index
    %11 = vector.load %arg8[%c0_12, %c512] : memref<32x1152xf32, #tpu.memory_space<vmem>>, vector<16x128xf32>
    tpu.vector_store %arg8[%c0_12, %c512], %10 {strides = array<i32>} : memref<32x1152xf32, #tpu.memory_space<vmem>>, vector<16x128xf32>,
    %c1_13 = arith.constant 1 : index
    %c0_14 = arith.constant 0 : index
    %12 = vector.load %arg1[%c1_13, %c0_14] : memref<32x128xf32, #tpu.memory_space<vmem>>, vector<15x128xf32>
    %c0_15 = arith.constant 0 : index
    %c640 = arith.constant 640 : index
    %13 = vector.load %arg8[%c0_15, %c640] : memref<32x1152xf32, #tpu.memory_space<vmem>>, vector<15x128xf32>
    tpu.vector_store %arg8[%c0_15, %c640], %12 {strides = array<i32>} : memref<32x1152xf32, #tpu.memory_space<vmem>>, vector<15x128xf32>,
    %c3_16 = arith.constant 3 : index
    %c0_17 = arith.constant 0 : index
    %14 = vector.load %arg1[%c3_16, %c0_17] : memref<32x128xf32, #tpu.memory_space<vmem>>, vector<13x128xf32>
    %c0_18 = arith.constant 0 : index
    %c768 = arith.constant 768 : index
    %15 = vector.load %arg8[%c0_18, %c768] : memref<32x1152xf32, #tpu.memory_space<vmem>>, vector<13x128xf32>
    tpu.vector_store %arg8[%c0_18, %c768], %14 {strides = array<i32>} : memref<32x1152xf32, #tpu.memory_space<vmem>>, vector<13x128xf32>,
    %c5_19 = arith.constant 5 : index
    %c0_20 = arith.constant 0 : index
    %16 = vector.load %arg1[%c5_19, %c0_20] : memref<32x128xf32, #tpu.memory_space<vmem>>, vector<11x128xf32>
    %c0_21 = arith.constant 0 : index
    %c896 = arith.constant 896 : index
    %17 = vector.load %arg8[%c0_21, %c896] : memref<32x1152xf32, #tpu.memory_space<vmem>>, vector<11x128xf32>
    tpu.vector_store %arg8[%c0_21, %c896], %16 {strides = array<i32>} : memref<32x1152xf32, #tpu.memory_space<vmem>>, vector<11x128xf32>,
    %c7_22 = arith.constant 7 : index
    %c0_23 = arith.constant 0 : index
    %18 = vector.load %arg1[%c7_22, %c0_23] : memref<32x128xf32, #tpu.memory_space<vmem>>, vector<9x128xf32>
    %c0_24 = arith.constant 0 : index
    %c1024 = arith.constant 1024 : index
    %19 = vector.load %arg8[%c0_24, %c1024] : memref<32x1152xf32, #tpu.memory_space<vmem>>, vector<9x128xf32>
    tpu.vector_store %arg8[%c0_24, %c1024], %18 {strides = array<i32>} : memref<32x1152xf32, #tpu.memory_space<vmem>>, vector<9x128xf32>,
    %c16 = arith.constant 16 : index
    %c0_25 = arith.constant 0 : index
    %20 = vector.load %arg1[%c16, %c0_25] : memref<32x128xf32, #tpu.memory_space<vmem>>, vector<9x128xf32>
    %c23 = arith.constant 23 : index
    %c0_26 = arith.constant 0 : index
    %21 = vector.load %arg8[%c23, %c0_26] : memref<32x1152xf32, #tpu.memory_space<vmem>>, vector<9x128xf32>
    tpu.vector_store %arg8[%c23, %c0_26], %20 {strides = array<i32>} : memref<32x1152xf32, #tpu.memory_space<vmem>>, vector<9x128xf32>,
    %c16_27 = arith.constant 16 : index
    %c0_28 = arith.constant 0 : index
    %22 = vector.load %arg1[%c16_27, %c0_28] : memref<32x128xf32, #tpu.memory_space<vmem>>, vector<11x128xf32>
    %c21 = arith.constant 21 : index
    %c128_29 = arith.constant 128 : index
    %23 = vector.load %arg8[%c21, %c128_29] : memref<32x1152xf32, #tpu.memory_space<vmem>>, vector<11x128xf32>
    tpu.vector_store %arg8[%c21, %c128_29], %22 {strides = array<i32>} : memref<32x1152xf32, #tpu.memory_space<vmem>>, vector<11x128xf32>,
    %c16_30 = arith.constant 16 : index
    %c0_31 = arith.constant 0 : index
    %24 = vector.load %arg1[%c16_30, %c0_31] : memref<32x128xf32, #tpu.memory_space<vmem>>, vector<13x128xf32>
    %c19 = arith.constant 19 : index
    %c256_32 = arith.constant 256 : index
    %25 = vector.load %arg8[%c19, %c256_32] : memref<32x1152xf32, #tpu.memory_space<vmem>>, vector<13x128xf32>
    tpu.vector_store %arg8[%c19, %c256_32], %24 {strides = array<i32>} : memref<32x1152xf32, #tpu.memory_space<vmem>>, vector<13x128xf32>,
    %c16_33 = arith.constant 16 : index
    %c0_34 = arith.constant 0 : index
    %26 = vector.load %arg1[%c16_33, %c0_34] : memref<32x128xf32, #tpu.memory_space<vmem>>, vector<15x128xf32>
    %c17 = arith.constant 17 : index
    %c384_35 = arith.constant 384 : index
    %27 = vector.load %arg8[%c17, %c384_35] : memref<32x1152xf32, #tpu.memory_space<vmem>>, vector<15x128xf32>
    tpu.vector_store %arg8[%c17, %c384_35], %26 {strides = array<i32>} : memref<32x1152xf32, #tpu.memory_space<vmem>>, vector<15x128xf32>,
    %c16_36 = arith.constant 16 : index
    %c0_37 = arith.constant 0 : index
    %28 = vector.load %arg1[%c16_36, %c0_37] : memref<32x128xf32, #tpu.memory_space<vmem>>, vector<16x128xf32>
    %c16_38 = arith.constant 16 : index
    %c512_39 = arith.constant 512 : index
    %29 = vector.load %arg8[%c16_38, %c512_39] : memref<32x1152xf32, #tpu.memory_space<vmem>>, vector<16x128xf32>
    tpu.vector_store %arg8[%c16_38, %c512_39], %28 {strides = array<i32>} : memref<32x1152xf32, #tpu.memory_space<vmem>>, vector<16x128xf32>,
    %c17_40 = arith.constant 17 : index
    %c0_41 = arith.constant 0 : index
    %30 = vector.load %arg1[%c17_40, %c0_41] : memref<32x128xf32, #tpu.memory_space<vmem>>, vector<15x128xf32>
    %c16_42 = arith.constant 16 : index
    %c640_43 = arith.constant 640 : index
    %31 = vector.load %arg8[%c16_42, %c640_43] : memref<32x1152xf32, #tpu.memory_space<vmem>>, vector<15x128xf32>
    tpu.vector_store %arg8[%c16_42, %c640_43], %30 {strides = array<i32>} : memref<32x1152xf32, #tpu.memory_space<vmem>>, vector<15x128xf32>,
    %c19_44 = arith.constant 19 : index
    %c0_45 = arith.constant 0 : index
    %32 = vector.load %arg1[%c19_44, %c0_45] : memref<32x128xf32, #tpu.memory_space<vmem>>, vector<13x128xf32>
    %c16_46 = arith.constant 16 : index
    %c768_47 = arith.constant 768 : index
    %33 = vector.load %arg8[%c16_46, %c768_47] : memref<32x1152xf32, #tpu.memory_space<vmem>>, vector<13x128xf32>
    tpu.vector_store %arg8[%c16_46, %c768_47], %32 {strides = array<i32>} : memref<32x1152xf32, #tpu.memory_space<vmem>>, vector<13x128xf32>,
    %c21_48 = arith.constant 21 : index
    %c0_49 = arith.constant 0 : index
    %34 = vector.load %arg1[%c21_48, %c0_49] : memref<32x128xf32, #tpu.memory_space<vmem>>, vector<11x128xf32>
    %c16_50 = arith.constant 16 : index
    %c896_51 = arith.constant 896 : index
    %35 = vector.load %arg8[%c16_50, %c896_51] : memref<32x1152xf32, #tpu.memory_space<vmem>>, vector<11x128xf32>
    tpu.vector_store %arg8[%c16_50, %c896_51], %34 {strides = array<i32>} : memref<32x1152xf32, #tpu.memory_space<vmem>>, vector<11x128xf32>,
    %c23_52 = arith.constant 23 : index
    %c0_53 = arith.constant 0 : index
    %36 = vector.load %arg1[%c23_52, %c0_53] : memref<32x128xf32, #tpu.memory_space<vmem>>, vector<9x128xf32>
    %c16_54 = arith.constant 16 : index
    %c1024_55 = arith.constant 1024 : index
    %37 = vector.load %arg8[%c16_54, %c1024_55] : memref<32x1152xf32, #tpu.memory_space<vmem>>, vector<9x128xf32>
    tpu.vector_store %arg8[%c16_54, %c1024_55], %36 {strides = array<i32>} : memref<32x1152xf32, #tpu.memory_space<vmem>>, vector<9x128xf32>,
    %c0_56 = arith.constant 0 : index
    %c0_57 = arith.constant 0 : index
    %38 = vector.load %arg8[%c0_56, %c0_57] : memref<32x1152xf32, #tpu.memory_space<vmem>>, vector<32x1152xf32>
    %39 = arith.truncf %38 : vector<32x1152xf32> to vector<32x1152xbf16>
    %c0_58 = arith.constant 0 : index
    %c0_59 = arith.constant 0 : index
    %40 = vector.load %arg2[%c0_58, %c0_59] : memref<1152x256xbf16, #tpu.memory_space<vmem>>, vector<1152x256xbf16>
    %cst_60 = arith.constant dense<0.000000e+00> : vector<32x256xf32>
    %41 = tpu.matmul %39, %40, %cst_60 {dimension_numbers = #tpu.dot_dimension_numbers<[1], [0], [0], [1], [0, 0, 1, 1], [], []>} : vector<32x1152xbf16>, vector<1152x256xbf16>, vector<32x256xf32> -> vector<32x256xf32>
    %c0_61 = arith.constant 0 : index
    %c0_62 = arith.constant 0 : index
    %42 = vector.load %arg3[%c0_61, %c0_62] : memref<1x256xf32, #tpu.memory_space<vmem>>, vector<1x256xf32>
    %43 = vector.broadcast %42 : vector<1x256xf32> to vector<32x256xf32>
    %44 = arith.addf %41, %43 : vector<32x256xf32>
    %45 = arith.truncf %44 : vector<32x256xf32> to vector<32x256xbf16>
    %c0_63 = arith.constant 0 : index
    %c0_64 = arith.constant 0 : index
    %46 = vector.load %arg4[%c0_63, %c0_64] : memref<256x512xbf16, #tpu.memory_space<vmem>>, vector<256x512xbf16>
    %cst_65 = arith.constant dense<0.000000e+00> : vector<32x512xf32>
    %47 = tpu.matmul %45, %46, %cst_65 {dimension_numbers = #tpu.dot_dimension_numbers<[1], [0], [0], [1], [0, 0, 1, 1], [], []>} : vector<32x256xbf16>, vector<256x512xbf16>, vector<32x512xf32> -> vector<32x512xf32>
    %48 = arith.mulf %47, %47 : vector<32x512xf32>
    %49 = arith.truncf %48 : vector<32x512xf32> to vector<32x512xbf16>
    %c0_66 = arith.constant 0 : index
    %c0_67 = arith.constant 0 : index
    %50 = vector.load %arg5[%c0_66, %c0_67] : memref<512x256xbf16, #tpu.memory_space<vmem>>, vector<512x256xbf16>
    %cst_68 = arith.constant dense<0.000000e+00> : vector<32x256xf32>
    %51 = tpu.matmul %49, %50, %cst_68 {dimension_numbers = #tpu.dot_dimension_numbers<[1], [0], [0], [1], [0, 0, 1, 1], [], []>} : vector<32x512xbf16>, vector<512x256xbf16>, vector<32x256xf32> -> vector<32x256xf32>
    %52 = vector.extract_strided_slice %51 {offsets = [0, 0], sizes = [32, 128], strides = [1, 1]} : vector<32x256xf32> to vector<32x128xf32>
    %53 = vector.extract_strided_slice %51 {offsets = [0, 128], sizes = [32, 128], strides = [1, 1]} : vector<32x256xf32> to vector<32x128xf32>
    %cst_69 = arith.constant 9.99999996E-13 : f32
    %54 = vector.broadcast %cst_69 : f32 to vector<32x128xf32>
    %55 = arith.addf %53, %54 : vector<32x128xf32>
    %56 = tpu.reciprocal %55 {approx = true} : vector<32x128xf32> -> vector<32x128xf32>
    %57 = arith.mulf %52, %56 : vector<32x128xf32>
    %c0_70 = arith.constant 0 : index
    %c0_71 = arith.constant 0 : index
    %58 = vector.load %arg6[%c0_70, %c0_71] : memref<1x128xf32, #tpu.memory_space<vmem>>, vector<1x128xf32>
    %59 = vector.broadcast %58 : vector<1x128xf32> to vector<32x128xf32>
    %60 = arith.addf %57, %59 : vector<32x128xf32>
    %61 = arith.negf %60 : vector<32x128xf32>
    %62 = math.exp %61 : vector<32x128xf32>
    %cst_72 = arith.constant 1.000000e+00 : f32
    %63 = vector.broadcast %cst_72 : f32 to vector<32x128xf32>
    %64 = arith.addf %63, %62 : vector<32x128xf32>
    %65 = arith.divf %63, %64 : vector<32x128xf32>
    %66 = arith.negf %65 : vector<32x128xf32>
    %67 = math.exp %66 : vector<32x128xf32>
    %cst_73 = arith.constant 1.000000e+00 : f32
    %68 = vector.broadcast %cst_73 : f32 to vector<32x128xf32>
    %69 = arith.addf %68, %67 : vector<32x128xf32>
    %70 = arith.divf %68, %69 : vector<32x128xf32>
    %c0_74 = arith.constant 0 : index
    %c0_75 = arith.constant 0 : index
    %71 = vector.load %arg7[%c0_74, %c0_75] : memref<32x128xf32, #tpu.memory_space<vmem>>, vector<32x128xf32>
    tpu.vector_store %arg7[%c0_74, %c0_75], %70 {strides = array<i32>} : memref<32x128xf32, #tpu.memory_space<vmem>>, vector<32x128xf32>,
    return
  }
  func.func @transform_0(%arg0: i32) -> (i32, i32) {
    %c0_i32 = arith.constant 0 : i32
    %c0_i32_0 = arith.constant 0 : i32
    return %arg0, %c0_i32 : i32, i32
  }
  func.func @transform_1(%arg0: i32) -> (i32, i32) {
    %c0_i32 = arith.constant 0 : i32
    %c0_i32_0 = arith.constant 0 : i32
    %c0_i32_1 = arith.constant 0 : i32
    return %c0_i32, %c0_i32_0 : i32, i32
  }
  func.func @transform_2(%arg0: i32) -> (i32, i32) {
    %c0_i32 = arith.constant 0 : i32
    %c0_i32_0 = arith.constant 0 : i32
    %c0_i32_1 = arith.constant 0 : i32
    return %c0_i32, %c0_i32_0 : i32, i32
  }
  func.func @transform_3(%arg0: i32) -> (i32, i32) {
    %c0_i32 = arith.constant 0 : i32
    %c0_i32_0 = arith.constant 0 : i32
    %c0_i32_1 = arith.constant 0 : i32
    return %c0_i32, %c0_i32_0 : i32, i32
  }
  func.func @transform_4(%arg0: i32) -> (i32, i32) {
    %c0_i32 = arith.constant 0 : i32
    %c0_i32_0 = arith.constant 0 : i32
    %c0_i32_1 = arith.constant 0 : i32
    return %c0_i32, %c0_i32_0 : i32, i32
  }
  func.func @transform_5(%arg0: i32) -> (i32, i32) {
    %c0_i32 = arith.constant 0 : i32
    %c0_i32_0 = arith.constant 0 : i32
    %c0_i32_1 = arith.constant 0 : i32
    return %c0_i32, %c0_i32_0 : i32, i32
  }
  func.func @transform_6(%arg0: i32) -> (i32, i32) {
    %c0_i32 = arith.constant 0 : i32
    %c0_i32_0 = arith.constant 0 : i32
    return %arg0, %c0_i32 : i32, i32
  }
}

</mosaic_0001>

<bundles_post_ra>
// kernel: tile.16
= control target key start
LH: loop header
LB: loop body
LE: loop exit
PB: predicated region body
PF: predicated region fallthrough
CT: control target
= control target key end

     0   :  { %2 = vsyncpa [#allocation1], 0  ;;  %s47_s6 = smov [#allocation0]   ;;  %s76_s0 = inlined_call_operand.hbm [shape: f32[8], index: 0, kind: input, shape index: {}]   ;;  %s77_s1 = inlined_call_operand.vmem [shape: f32[16,8], index: 1, kind: output, shape index: {}]  }
   0x1   :  { %s9_s7 = sshll.u32 %s47_s6, 4  ;;  %s23_s10 = scalar_lea.hbm %s76_s0, 16  ;;  %s10_s7 = int_to_ptr.vmem [resolvable:$true] %s9_s7 }
   0x2   :  { %p24_p0 = scmp.ne.s32.totalorder %s76_s0, %s23_s10  ;;  %p27_p1 = scmp.lt.u32.totalorder %s23_s10, %s76_s0 }
   0x4   :  { %p29_p2 = pnand %p27_p1, %p24_p0 }
   0x6   :  { %32 = shalt.err (!%p29_p2)
}
   0x7   :  { %s33_s15 = scalar_lea.vmem %s10_s7, 16  ;;  %s37_s16 = scalar_lea.vmem %s10_s7, 32 }
   0x8   :  { %p34_p3 = scmp.ne.s32.totalorder %s10_s7, %s33_s15  ;;  %p38_p4 = scmp.lt.s32.totalorder %s10_s7, %s10_s7 }
   0x9   :  { %p39_p5 = scmp.lt.s32.totalorder %s37_s16, %s33_s15 }
   0xb   :  { %p40_p6 = por %p39_p5, %p38_p4 }
   0xd   :  { %p41_p7 = pnand %p40_p6, %p34_p3 }
   0xf   :  { %44 = shalt.err (!%p41_p7)
}
  0x10   :  { %12 = dma.hbm_to_vmem [thread:$0]  %s76_s0, 16, %s10_s7, [#allocation1]  }
  0x11   :  { %45 = dma.done.wait [#allocation1], 16  }
  0x12   :  { %46 = vsyncadd [#allocation1], 4294967280  ;;  %v16_v0 = vld [vmem:[#allocation0] ss:$0 sm:$0xff] }
  0x13   :  { %17 = vst [vmem:[%s77_s1] sm:$0xff] %v16_v0  ;;  %21 = vst [vmem:[%s77_s1 + $0x8] sm:$0xff] %v16_v0 }
  0x14   :  { %20 = vsyncpa [#allocation1], 1 }

// kernel: tile.17
= control target key start
LH: loop header
LB: loop body
LE: loop exit
PB: predicated region body
PF: predicated region fallthrough
CT: control target
= control target key end

     0   :  { %s131_s10 = smov 120   ;;  %s132_s11 = smov 104   ;;  %vm3_vm0 = vcmask 64512   ;;  %vm9_vm1 = vcmask 1048512   ;;  %vm15_vm2 = vcmask 982912   ;;  %vm21_vm3 = vcmask 917312   ;;  %s207_s0 = inlined_call_operand.vmem [shape: f32[16,8], index: 0, kind: input, shape index: {}]   ;;  %s208_s1 = inlined_call_operand.vmem [shape: f32[1,128], index: 1, kind: output, shape index: {}]  }
   0x1   :  { %v101_v0 = vld [vmem:[%s207_s0 + $0xf] sm:$0x1]   ;;  %v103_v1 = vld [vmem:[%s207_s0 + $0xd] sm:$0x1]   ;;  %v102_v2 = vld [vmem:[%s207_s0 + $0xe] sm:$0x1]  }
   0x2   :  { %7 = vrot.lane.b32.xlu0 %v101_v0, %s131_s10  ;;  %19 = vrot.lane.b32.xlu1 %v103_v1, %s132_s11  ;;  %v104_v3 = vld [vmem:[%s207_s0 + $0xc] sm:$0x1]   ;;  %s133_s16 = smov 112   ;;  %s134_s17 = smov 96   ;;  %v105_v4 = vld [vmem:[%s207_s0 + $0xb] sm:$0x1]  }
   0x3   :  { %v106_v5 = vld [vmem:[%s207_s0 + $0xa] sm:$0x1]   ;;  %v2_v6 = vld [vmem:[%s207_s0] sm:$0x1]   ;;  %s135_s24 = smov 88   ;;  %s136_s25 = smov 80  }
   0x4   :  { %4 = vst.msk [vmem:[#allocation0] sm:$0x1] %vm3_vm0, %v2_v6   ;;  %v107_v7 = vld [vmem:[%s207_s0 + $0x9] sm:$0x1]   ;;  %v108_v8 = vld [vmem:[%s207_s0 + $0x8] sm:$0x1]  }
   0x5   :  { %s137_s30 = smov 72   ;;  %s138_s2 = smov 64   ;;  %v109_v9 = vld [vmem:[%s207_s0 + $0x7] sm:$0x1]   ;;  %v110_v10 = vld [vmem:[%s207_s0 + $0x6] sm:$0x1]  }
   0x6   :  { %13 = vrot.lane.b32.xlu0 %v102_v2, %s133_s16  ;;  %25 = vrot.lane.b32.xlu1 %v104_v3, %s134_s17  ;;  %s139_s7 = smov 56   ;;  %s140_s8 = smov 48   ;;  %v111_v11 = vld [vmem:[%s207_s0 + $0x5] sm:$0x1]   ;;  %v112_v12 = vld [vmem:[%s207_s0 + $0x4] sm:$0x1]  }
   0x7   :  { %s141_s13 = smov 40   ;;  %s142_s14 = smov 32   ;;  %v113_v13 = vld [vmem:[%s207_s0 + $0x3] sm:$0x1]   ;;  %v114_v14 = vld [vmem:[%s207_s0 + $0x2] sm:$0x1]  }
   0x8   :  { %s143_s19 = smov 24   ;;  %s144_s20 = smov 16   ;;  %v115_v15 = vld [vmem:[%s207_s0 + $0x1] sm:$0x1]   ;;  %vm27_vm4 = vcmask 851712   ;;  %vm33_vm5 = vcmask 786112  }
   0x9   :  { %s145_s0 = smov 8   ;;  %vm39_vm6 = vcmask 720512   ;;  %vm45_vm7 = vcmask 654912   ;;  %vm51_vm8 = vcmask 589312   ;;  %vm57_vm9 = vcmask 523712  }
   0xa   :  { %31 = vrot.lane.b32.xlu0 %v105_v4, %s135_s24  ;;  %37 = vrot.lane.b32.xlu1 %v106_v5, %s136_s25  ;;  %vm63_vm10 = vcmask 458112   ;;  %vm69_vm11 = vcmask 392512   ;;  %vm75_vm12 = vcmask 326912   ;;  %vm81_vm13 = vcmask 261312  }
   0xb   :  { %vm87_vm14 = vcmask 195712   ;;  %vm93_vm15 = vcmask 130112  }
   0xe   :  { %43 = vrot.lane.b32.xlu0 %v107_v7, %s137_s30  ;;  %49 = vrot.lane.b32.xlu1 %v108_v8, %s138_s2 }
  0x12   :  { %55 = vrot.lane.b32.xlu0 %v109_v9, %s139_s7  ;;  %61 = vrot.lane.b32.xlu1 %v110_v10, %s140_s8 }
  0x16   :  { %67 = vrot.lane.b32.xlu0 %v111_v11, %s141_s13  ;;  %73 = vrot.lane.b32.xlu1 %v112_v12, %s142_s14 }
  0x1a   :  { %79 = vrot.lane.b32.xlu0 %v113_v13, %s143_s19  ;;  %85 = vrot.lane.b32.xlu1 %v114_v14, %s144_s20 }
  0x1e   :  { %91 = vrot.lane.b32.xlu0 %v115_v15, %s145_s0 }
  0x74   :  { %v8_v16 = vpop.permute.xlu0 %7   ;;  %v20_v17 = vpop.permute.xlu1 %19  }
  0x75   :  { %10 = vst.msk [vmem:[#allocation0] sm:$0x1] %vm9_vm1, %v8_v16  }
  0x78   :  { %v14_v18 = vpop.permute.xlu0 %13   ;;  %v26_v19 = vpop.permute.xlu1 %25  }
  0x79   :  { %16 = vst.msk [vmem:[#allocation0] sm:$0x1] %vm15_vm2, %v14_v18  }
  0x7a   :  { %22 = vst.msk [vmem:[#allocation0] sm:$0x1] %vm21_vm3, %v20_v17  }
  0x7b   :  { %28 = vst.msk [vmem:[#allocation0] sm:$0x1] %vm27_vm4, %v26_v19  }
  0x7c   :  { %v32_v20 = vpop.permute.xlu0 %31   ;;  %v38_v21 = vpop.permute.xlu1 %37  }
  0x7d   :  { %34 = vst.msk [vmem:[#allocation0] sm:$0x1] %vm33_vm5, %v32_v20  }
  0x7e   :  { %40 = vst.msk [vmem:[#allocation0] sm:$0x1] %vm39_vm6, %v38_v21  }
  0x80   :  { %v44_v22 = vpop.permute.xlu0 %43   ;;  %v50_v23 = vpop.permute.xlu1 %49  }
  0x81   :  { %46 = vst.msk [vmem:[#allocation0] sm:$0x1] %vm45_vm7, %v44_v22  }
  0x82   :  { %52 = vst.msk [vmem:[#allocation0] sm:$0x1] %vm51_vm8, %v50_v23  }
  0x84   :  { %v56_v24 = vpop.permute.xlu0 %55   ;;  %v62_v25 = vpop.permute.xlu1 %61  }
  0x85   :  { %58 = vst.msk [vmem:[#allocation0] sm:$0x1] %vm57_vm9, %v56_v24  }
  0x86   :  { %64 = vst.msk [vmem:[#allocation0] sm:$0x1] %vm63_vm10, %v62_v25  }
  0x88   :  { %v68_v26 = vpop.permute.xlu0 %67   ;;  %v74_v27 = vpop.permute.xlu1 %73  }
  0x89   :  { %70 = vst.msk [vmem:[#allocation0] sm:$0x1] %vm69_vm11, %v68_v26  }
  0x8a   :  { %76 = vst.msk [vmem:[#allocation0] sm:$0x1] %vm75_vm12, %v74_v27  }
  0x8c   :  { %v80_v28 = vpop.permute.xlu0 %79   ;;  %v86_v29 = vpop.permute.xlu1 %85  }
  0x8d   :  { %82 = vst.msk [vmem:[#allocation0] sm:$0x1] %vm81_vm13, %v80_v28  }
  0x8e   :  { %88 = vst.msk [vmem:[#allocation0] sm:$0x1] %vm87_vm14, %v86_v29  }
  0x90   :  { %v92_v30 = vpop.permute.xlu0 %91  }
  0x91   :  { %94 = vst.msk [vmem:[#allocation0] sm:$0x1] %vm93_vm15, %v92_v30  }
  0x98   :  { %v98_v31 = vld [vmem:[#allocation0] sm:$0x1] }
  0x99   :  { %100 = vst [vmem:[%s208_s1] sm:$0x1] %v98_v31 }

// kernel: tile.12
= control target key start
LH: loop header
LB: loop body
LE: loop exit
PB: predicated region body
PF: predicated region fallthrough
CT: control target
= control target key end

     0   :  { %s28_s0 = inlined_call_operand.vmem [shape: f32[16], index: 0, kind: input, shape index: {}]   ;;  %s29_s1 = inlined_call_operand.vmem [shape: f32[16,16], index: 1, kind: output, shape index: {}]  }
   0x1   :  { %v4_v0 = vld [vmem:[%s28_s0] ss:$0 sm:$0xff] }
   0x2   :  { %5 = vst [vmem:[%s29_s1] sm:$0xff] %v4_v0  ;;  %8 = vst [vmem:[%s29_s1 + $0x8] sm:$0xff] %v4_v0 }

// kernel: tile.13
= control target key start
LH: loop header
LB: loop body
LE: loop exit
PB: predicated region body
PF: predicated region fallthrough
CT: control target
= control target key end

     0   :  { %s7_s6 = smov 3  ;;  %s21_s9 = smov 3  ;;  %vm4_vm0 = vcmask 130048   ;;  %vm11_vm1 = vcmask 1048448   ;;  %vm18_vm2 = vcmask 917248   ;;  %vm25_vm3 = vcmask 786048   ;;  %s128_s0 = inlined_call_operand.vmem [shape: f32[16,16], index: 0, kind: input, shape index: {}]   ;;  %s129_s1 = inlined_call_operand.vmem [shape: f32[1,256], index: 1, kind: output, shape index: {}]  }
   0x1   :  { %v66_v0 = vld [vmem:[%s128_s0 + $0x7] ss:$8 sm:%s7_s6]   ;;  %s81_s10 = smov 112   ;;  %v68_v1 = vld [vmem:[%s128_s0 + $0x5] ss:$8 sm:%s21_s9]   ;;  %s14_s13 = smov 3 }
   0x2   :  { %9 = vrot.lane.b32.xlu0 %v66_v0, %s81_s10  ;;  %s82_s14 = smov 80   ;;  %v67_v2 = vld [vmem:[%s128_s0 + $0x6] ss:$8 sm:%s14_s13]   ;;  %s28_s17 = smov 3  ;;  %vm32_vm4 = vcmask 654848   ;;  %vm39_vm5 = vcmask 523648  }
   0x3   :  { %23 = vrot.lane.b32.xlu1 %v68_v1, %s82_s14  ;;  %v69_v3 = vld [vmem:[%s128_s0 + $0x4] ss:$8 sm:%s28_s17]   ;;  %s35_s20 = smov 3  ;;  %s42_s21 = smov 3  ;;  %vm46_vm6 = vcmask 392448   ;;  %vm53_vm7 = vcmask 261248  }
   0x4   :  { %s83_s22 = smov 96   ;;  %s84_s23 = smov 64   ;;  %v70_v4 = vld [vmem:[%s128_s0 + $0x3] ss:$8 sm:%s35_s20]   ;;  %v71_v5 = vld [vmem:[%s128_s0 + $0x2] ss:$8 sm:%s42_s21]  }
   0x5   :  { %s2_s26 = smov 3  ;;  %s49_s29 = smov 3 }
   0x6   :  { %16 = vrot.lane.b32.xlu0 %v67_v2, %s83_s22  ;;  %v3_v6 = vld [vmem:[%s128_s0] ss:$8 sm:%s2_s26]   ;;  %s85_s3 = smov 48   ;;  %s86_s4 = smov 32  }
   0x7   :  { %30 = vrot.lane.b32.xlu1 %v69_v3, %s84_s23  ;;  %5 = vst.msk [vmem:[#allocation0] ss:$8 sm:$0x3] %vm4_vm0, %v3_v6   ;;  %v72_v7 = vld [vmem:[%s128_s0 + $0x1] ss:$8 sm:%s49_s29]   ;;  %s87_s0 = smov 16  }
   0xa   :  { %37 = vrot.lane.b32.xlu0 %v70_v4, %s85_s3 }
   0xb   :  { %44 = vrot.lane.b32.xlu1 %v71_v5, %s86_s4 }
   0xe   :  { %51 = vrot.lane.b32.xlu0 %v72_v7, %s87_s0 }
  0x74   :  { %v10_v8 = vpop.permute.xlu0 %9  }
  0x75   :  { %12 = vst.msk [vmem:[#allocation0] ss:$8 sm:$0x3] %vm11_vm1, %v10_v8   ;;  %v24_v9 = vpop.permute.xlu1 %23  }
  0x78   :  { %v17_v10 = vpop.permute.xlu0 %16  }
  0x79   :  { %19 = vst.msk [vmem:[#allocation0] ss:$8 sm:$0x3] %vm18_vm2, %v17_v10   ;;  %v31_v11 = vpop.permute.xlu1 %30  }
  0x7a   :  { %26 = vst.msk [vmem:[#allocation0] ss:$8 sm:$0x3] %vm25_vm3, %v24_v9  }
  0x7b   :  { %33 = vst.msk [vmem:[#allocation0] ss:$8 sm:$0x3] %vm32_vm4, %v31_v11  }
  0x7c   :  { %v38_v12 = vpop.permute.xlu0 %37  }
  0x7d   :  { %40 = vst.msk [vmem:[#allocation0] ss:$8 sm:$0x3] %vm39_vm5, %v38_v12   ;;  %v45_v13 = vpop.permute.xlu1 %44  }
  0x7e   :  { %47 = vst.msk [vmem:[#allocation0] ss:$8 sm:$0x3] %vm46_vm6, %v45_v13  }
  0x80   :  { %v52_v14 = vpop.permute.xlu0 %51  }
  0x81   :  { %54 = vst.msk [vmem:[#allocation0] ss:$8 sm:$0x3] %vm53_vm7, %v52_v14  }
  0x88   :  { %v58_v15 = vld [vmem:[#allocation0] sm:$0x1]  ;;  %v62_v16 = vld [vmem:[#allocation0 + $0x8] sm:$0x1] }
  0x89   :  { %60 = vst [vmem:[%s129_s1] sm:$0x1] %v58_v15  ;;  %73 = vst [vmem:[%s129_s1 + $0x1] sm:$0x1] %v62_v16 }

// kernel: multi_scale_quantum_block.1
= control target key start
LH: loop header
LB: loop body
LE: loop exit
PB: predicated region body
PF: predicated region fallthrough
CT: control target
= control target key end

     0   :  { %v3253_v1 = vmov 0.0   ;;  %vm76_vm0 = vcmask 1044480   ;;  %vm64_vm1 = vcmask 1046528   ;;  %vm100_vm2 = vcmask 1040384   ;;  %s4287_s1 = inlined_call_operand.vmem [shape: bf16[1152,256], index: 1, kind: input, shape index: {}]   ;;  %s4288_s0 = inlined_call_operand.vmem [shape: f32[32,128], index: 0, kind: input, shape index: {}]   ;;  %s4289_s3 = inlined_call_operand.vmem [shape: bf16[256,512], index: 3, kind: input, shape index: {}]   ;;  %s4290_s4 = inlined_call_operand.vmem [shape: bf16[512,256], index: 4, kind: input, shape index: {}]   ;;  %s4291_s2 = inlined_call_operand.vmem [shape: f32[1,256], index: 2, kind: input, shape index: {}]   ;;  %s4292_s5 = inlined_call_operand.vmem [shape: f32[1,128], index: 5, kind: input, shape index: {}]   ;;  %s4293_s6 = inlined_call_operand.vmem [shape: f32[32,128], index: 6, kind: output, shape index: {}]  }
   0x1   :  { %v2805_v0 = vld [vmem:[%s4287_s1 + $0x4] ss:$8 sps:$4 sm:$0xff]   ;;  %25 = vst [vmem:[#allocation2 + $0x8] sm:$0xff] %v3253_v1  ;;  %24 = vst [vmem:[#allocation2] sm:$0xff] %v3253_v1  ;;  %v2807_v2 = vld [vmem:[%s4287_s1] ss:$8 sps:$4 sm:$0xff]  }
   0x2   :  { %26 = vst [vmem:[#allocation2 + $0x10] sm:$0xff] %v3253_v1  ;;  %27 = vst [vmem:[#allocation2 + $0x18] sm:$0xff] %v3253_v1  ;;  %1122 = vmatprep.subr.bf16.mxu0 %v2805_v0  ;;  %v2808_v3 = vld [vmem:[%s4287_s1 + $0x14] ss:$8 sps:$4 sm:$0xff]   ;;  %v2810_v4 = vld [vmem:[%s4287_s1 + $0x10] ss:$8 sps:$4 sm:$0xff]  }
   0x3   :  { %38 = vst [vmem:[#allocation2 + $0x70] sm:$0xff] %v3253_v1  ;;  %39 = vst [vmem:[#allocation2 + $0x78] sm:$0xff] %v3253_v1  ;;  %1123 = vmatpush1.bf16.msra.mxu0 %v2807_v2  ;;  %v2811_v5 = vld [vmem:[%s4287_s1 + $0x24] ss:$8 sps:$4 sm:$0xff]   ;;  %v2813_v6 = vld [vmem:[%s4287_s1 + $0x20] ss:$8 sps:$4 sm:$0xff]  }
   0x4   :  { %40 = vst [vmem:[#allocation2 + $0x80] sm:$0xff] %v3253_v1  ;;  %41 = vst [vmem:[#allocation2 + $0x88] sm:$0xff] %v3253_v1  ;;  %1124 = vmatprep.subr.bf16.mxu0 %v2808_v3  ;;  %v2814_v7 = vld [vmem:[%s4287_s1 + $0x34] ss:$8 sps:$4 sm:$0xff]   ;;  %v2816_v8 = vld [vmem:[%s4287_s1 + $0x30] ss:$8 sps:$4 sm:$0xff]  }
   0x5   :  { %42 = vst [vmem:[#allocation2 + $0x90] sm:$0xff] %v3253_v1  ;;  %43 = vst [vmem:[#allocation2 + $0x98] sm:$0xff] %v3253_v1  ;;  %v2817_v9 = vld [vmem:[%s4287_s1 + $0x44] ss:$8 sps:$4 sm:$0xff]   ;;  %v2819_v10 = vld [vmem:[%s4287_s1 + $0x40] ss:$8 sps:$4 sm:$0xff]  }
   0x6   :  { %44 = vst [vmem:[#allocation2 + $0xa0] sm:$0xff] %v3253_v1  ;;  %45 = vst [vmem:[#allocation2 + $0xa8] sm:$0xff] %v3253_v1  ;;  %v2820_v11 = vld [vmem:[%s4287_s1 + $0x54] ss:$8 sps:$4 sm:$0xff]   ;;  %v2822_v12 = vld [vmem:[%s4287_s1 + $0x50] ss:$8 sps:$4 sm:$0xff]  }
   0x7   :  { %56 = vst [vmem:[#allocation2 + $0x100] sm:$0xff] %v3253_v1  ;;  %57 = vst [vmem:[#allocation2 + $0x108] sm:$0xff] %v3253_v1  ;;  %1125 = vmatpush1.bf16.msra.mxu0 %v2810_v4  ;;  %v2823_v13 = vld [vmem:[%s4287_s1 + $0x64] ss:$8 sps:$4 sm:$0xff]   ;;  %v73_v15 = vld [vmem:[%s4288_s0 + $0x8] sm:$0x7] }
   0x8   :  { %58 = vst [vmem:[#allocation2 + $0x110] sm:$0xff] %v3253_v1  ;;  %59 = vst [vmem:[#allocation2 + $0x118] sm:$0xff] %v3253_v1  ;;  %1126 = vmatprep.subr.bf16.mxu0 %v2811_v5  ;;  %v3332_v14 = vld [vmem:[%s4288_s0] sm:$0xff]  ;;  %v78_v17 = vrot.slane %v73_v15, 3  ;;  %v61_v19 = vld [vmem:[%s4288_s0 + $0x8] sm:$0x1] }
   0x9   :  { %v77_v16 = vrot.slane %v3332_v14, 3  ;;  %v2825_v18 = vld [vmem:[%s4287_s1 + $0x60] ss:$8 sps:$4 sm:$0xff]   ;;  %v65_v20 = vrot.slane %v3332_v14, 1  ;;  %v2826_v21 = vld [vmem:[%s4287_s1 + $0x74] ss:$8 sps:$4 sm:$0xff]  }
   0xa   :  { %v66_v23 = vrot.slane %v61_v19, 1  ;;  %v101_v24 = vrot.slane %v3332_v14, 7  ;;  %v89_v25 = vrot.slane %v3332_v14, 5  ;;  %v2828_v27 = vld [vmem:[%s4287_s1 + $0x70] ss:$8 sps:$4 sm:$0xff]   ;;  %vm88_vm3 = vcmask 1042432  }
   0xb   :  { %1127 = vmatpush1.bf16.msra.mxu0 %v2813_v6  ;;  %v79_v22 = vsel %vm76_vm0, %v77_v16, %v78_v17  ;;  %82 = vst [vmem:[#allocation2 + $0x8] sm:$0xe0] %v77_v16  ;;  %70 = vst [vmem:[#allocation2] sm:$0x80] %v65_v20  ;;  %v2829_v28 = vld [vmem:[%s4287_s1 + $0x84] ss:$8 sps:$4 sm:$0xff]  }
   0xc   :  { %1128 = vmatprep.subr.bf16.mxu0 %v2814_v7  ;;  %v3352_v26 = vsel %vm64_vm1, %v65_v20, %v66_v23  ;;  %106 = vst [vmem:[#allocation2 + $0x18] sm:$0xfe] %v101_v24  ;;  %94 = vst [vmem:[#allocation2 + $0x10] sm:$0xf8] %v89_v25  ;;  %v2831_v29 = vld [vmem:[%s4287_s1 + $0x80] ss:$8 sps:$4 sm:$0xff]  }
   0xd   :  { %v2832_v31 = vld [vmem:[%s4287_s1 + $0x94] ss:$8 sps:$4 sm:$0xff]   ;;  %v2834_v33 = vld [vmem:[%s4287_s1 + $0x90] ss:$8 sps:$4 sm:$0xff]   ;;  %v2835_v34 = vld [vmem:[%s4287_s1 + $0xa4] ss:$8 sps:$4 sm:$0xff]  }
   0xe   :  { %v2837_v35 = vld [vmem:[%s4287_s1 + $0xa0] ss:$8 sps:$4 sm:$0xff]   ;;  %v2838_v36 = vld [vmem:[%s4287_s1 + $0xb4] ss:$8 sps:$4 sm:$0xff]   ;;  %v140_v38 = vld [vmem:[%s4288_s0 + $0x18] sm:$0x7] }
   0xf   :  { %1129 = vmatpush1.bf16.msra.mxu0 %v2816_v8  ;;  %v3381_v37 = vld [vmem:[%s4288_s0 + $0x10] sm:$0xff]  ;;  %v144_v42 = vrot.slane %v140_v38, 3  ;;  %v2841_v43 = vld [vmem:[%s4287_s1 + $0xc4] ss:$8 sps:$4 sm:$0xff]   ;;  %v129_v44 = vld [vmem:[%s4288_s0 + $0x18] sm:$0x1] }
  0x10   :  { %1130 = vmatprep.subr.bf16.mxu0 %v2817_v9  ;;  %v143_v39 = vrot.slane %v3381_v37, 3  ;;  %v132_v40 = vrot.slane %v3381_v37, 1  ;;  %v2840_v41 = vld [vmem:[%s4287_s1 + $0xb0] ss:$8 sps:$4 sm:$0xff]   ;;  %v133_v46 = vrot.slane %v129_v44, 1  ;;  %v165_v49 = vrot.slane %v3381_v37, 7 }
  0x11   :  { %v97_v47 = vld [vmem:[%s4288_s0 + $0x8] sm:$0x7f]  ;;  %v154_v53 = vrot.slane %v3381_v37, 5  ;;  %v2844_v54 = vld [vmem:[%s4287_s1 + $0xd4] ss:$8 sps:$4 sm:$0xff]  }
  0x12   :  { %v193_v30 = vld [vmem:[#allocation2 + $0x8] sm:$0xff]  ;;  %148 = vst [vmem:[#allocation2 + $0x98] sm:$0xe0] %v143_v39  ;;  %137 = vst [vmem:[#allocation2 + $0x90] sm:$0x80] %v132_v40  ;;  %v145_v45 = vsel %vm76_vm0, %v143_v39, %v144_v42  ;;  %v102_v48 = vrot.slane %v97_v47, 7  ;;  %v134_v51 = vsel %vm64_vm1, %v132_v40, %v133_v46 }
  0x13   :  { %1131 = vmatpush1.bf16.msra.mxu0 %v2819_v10  ;;  %v229_v32 = vpack.c.bf16 %v79_v22, %v193_v30  ;;  %v2843_v50 = vld [vmem:[%s4287_s1 + $0xc0] ss:$8 sps:$4 sm:$0xff]   ;;  %170 = vst [vmem:[#allocation2 + $0xa8] sm:$0xfe] %v165_v49  ;;  %159 = vst [vmem:[#allocation2 + $0xa0] sm:$0xf8] %v154_v53 }
  0x14   :  { %1132 = vmatprep.subr.bf16.mxu0 %v2820_v11  ;;  %v85_v52 = vld [vmem:[%s4288_s0 + $0x8] sm:$0x1f]  ;;  %v103_v55 = vsel %vm100_vm2, %v101_v24, %v102_v48  ;;  %v2846_v58 = vld [vmem:[%s4287_s1 + $0xd0] ss:$8 sps:$4 sm:$0xff]   ;;  %v2850_v61 = vld [vmem:[%s4287_s1 + $0xf4] ss:$8 sps:$4 sm:$0xff]  }
  0x15   :  { %1154 = vmatprep.mubr.bf16.mxu0 %v229_v32  ;;  %v90_v56 = vrot.slane %v85_v52, 5  ;;  %v2847_v59 = vld [vmem:[%s4287_s1 + $0xe4] ss:$8 sps:$4 sm:$0xff]   ;;  %v2849_v60 = vld [vmem:[%s4287_s1 + $0xe0] ss:$8 sps:$4 sm:$0xff]   ;;  %v195_v11 = vld [vmem:[#allocation2 + $0x18] sm:$0xff] }
  0x16   :  { %v2852_v62 = vld [vmem:[%s4287_s1 + $0xf0] ss:$8 sps:$4 sm:$0xff]   ;;  %v192_v63 = vld [vmem:[#allocation2] sm:$0xff]  ;;  %v2858_v5 = vld [vmem:[%s4287_s1 + $0x114] ss:$8 sps:$4 sm:$0xff]  }
  0x17   :  { %1133 = vmatpush1.bf16.msra.mxu0 %v2822_v12  ;;  %v3415_v57 = vsel %vm88_vm3, %v89_v25, %v90_v56  ;;  %v2855_v0 = vld [vmem:[%s4287_s1 + $0x104] ss:$8 sps:$4 sm:$0xff]   ;;  %v228_v2 = vpack.c.bf16 %v3352_v26, %v192_v63  ;;  %v2853_v3 = vld [vmem:[%s4287_s1 + $0x100] ss:$8 sps:$4 sm:$0xff]   ;;  %v2856_v6 = vld [vmem:[%s4287_s1 + $0x110] ss:$8 sps:$4 sm:$0xff]  }
  0x18   :  { %1134 = vmatprep.subr.bf16.mxu0 %v2823_v13  ;;  %v162_v7 = vld [vmem:[%s4288_s0 + $0x18] sm:$0x7f]  ;;  %v2861_v8 = vld [vmem:[%s4287_s1 + $0x124] ss:$8 sps:$4 sm:$0xff]   ;;  %v2859_v19 = vld [vmem:[%s4287_s1 + $0x120] ss:$8 sps:$4 sm:$0xff]  }
  0x19   :  { %v211_v1 = vld [vmem:[#allocation2 + $0x98] sm:$0xff]  ;;  %v210_v9 = vld [vmem:[#allocation2 + $0x90] sm:$0xff]  ;;  %v166_v10 = vrot.slane %v162_v7, 7  ;;  %v3460_v17 = vld [vmem:[%s4288_s0 + $0x1] sm:$0xff] }
  0x1a   :  { %v238_v4 = vpack.c.bf16 %v145_v45, %v211_v1  ;;  %v151_v12 = vld [vmem:[%s4288_s0 + $0x18] sm:$0x1f]  ;;  %v237_v16 = vpack.c.bf16 %v134_v51, %v210_v9  ;;  %v3477_v23 = vld [vmem:[%s4288_s0 + $0x8] sm:$0xff]  ;;  %v194_v56 = vld [vmem:[#allocation2 + $0x10] sm:$0xff] }
  0x1b   :  { %1135 = vmatpush1.bf16.msra.mxu0 %v2825_v18  ;;  %v3455_v13 = vsel %vm100_vm2, %v165_v49, %v166_v10  ;;  %v155_v15 = vrot.slane %v151_v12, 5  ;;  %v113_v18 = vld [vmem:[%s4288_s0 + $0x9] sm:$0x7f]  ;;  %v2864_v20 = vld [vmem:[%s4287_s1 + $0x134] ss:$8 sps:$4 sm:$0xff]   ;;  %v232_v24 = vpack.c.bf16 %v3477_v23, %v3332_v14 }
  0x1c   :  { %1136 = vmatprep.subr.bf16.mxu0 %v2826_v21  ;;  %v231_v21 = vpack.c.bf16 %v103_v55, %v195_v11  ;;  %115 = vst [vmem:[#allocation2 + $0x70] sm:$0x7f] %v113_v18  ;;  %v2862_v25 = vld [vmem:[%s4287_s1 + $0x130] ss:$8 sps:$4 sm:$0xff]   ;;  %v2867_v26 = vld [vmem:[%s4287_s1 + $0x144] ss:$8 sps:$4 sm:$0xff]  }
  0x1d   :  { %v3472_v22 = vsel %vm88_vm3, %v154_v53, %v155_v15  ;;  %v2873_v30 = vld [vmem:[%s4287_s1 + $0x164] ss:$8 sps:$4 sm:$0xff]   ;;  %v2876_v32 = vld [vmem:[%s4287_s1 + $0x174] ss:$8 sps:$4 sm:$0xff]   ;;  %v2880_v38 = vld [vmem:[%s4287_s1 + $0x190] ss:$8 sps:$4 sm:$0xff]  }
  0x1e   :  { %v2885_v39 = vld [vmem:[%s4287_s1 + $0x1a4] ss:$8 sps:$4 sm:$0xff]   ;;  %v2883_v40 = vld [vmem:[%s4287_s1 + $0x1a0] ss:$8 sps:$4 sm:$0xff]   ;;  %v2886_v42 = vld [vmem:[%s4287_s1 + $0x1b0] ss:$8 sps:$4 sm:$0xff]  }
  0x1f   :  { %1137 = vmatpush1.bf16.msra.mxu0 %v2828_v27  ;;  %v2865_v27 = vld [vmem:[%s4287_s1 + $0x140] ss:$8 sps:$4 sm:$0xff]   ;;  %v177_v45 = vld [vmem:[%s4288_s0 + $0x19] sm:$0x7f]  ;;  %v2897_v48 = vld [vmem:[%s4287_s1 + $0x1e4] ss:$8 sps:$4 sm:$0xff]  }
  0x20   :  { %1138 = vmatprep.subr.bf16.mxu0 %v2829_v28  ;;  %v2870_v28 = vld [vmem:[%s4287_s1 + $0x154] ss:$8 sps:$4 sm:$0xff]   ;;  %v2889_v44 = vld [vmem:[%s4287_s1 + $0x1c0] ss:$8 sps:$4 sm:$0xff]   ;;  %179 = vst [vmem:[#allocation2 + $0x100] sm:$0x7f] %v177_v45 }
  0x21   :  { %v2894_v46 = vld [vmem:[%s4287_s1 + $0x1d4] ss:$8 sps:$4 sm:$0xff]   ;;  %v2892_v47 = vld [vmem:[%s4287_s1 + $0x1d0] ss:$8 sps:$4 sm:$0xff]   ;;  %v2895_v49 = vld [vmem:[%s4287_s1 + $0x1e0] ss:$8 sps:$4 sm:$0xff]  }
  0x22   :  { %v2900_v51 = vld [vmem:[%s4287_s1 + $0x1f4] ss:$8 sps:$4 sm:$0xff]   ;;  %v121_v53 = vld [vmem:[%s4288_s0 + $0xd] sm:$0x7]  ;;  %v2898_v55 = vld [vmem:[%s4287_s1 + $0x1f0] ss:$8 sps:$4 sm:$0xff]  }
  0x23   :  { %1139 = vmatpush1.bf16.msra.mxu0 %v2831_v29  ;;  %v2868_v29 = vld [vmem:[%s4287_s1 + $0x150] ss:$8 sps:$4 sm:$0xff]   ;;  %123 = vst [vmem:[#allocation2 + $0x80] sm:$0x7] %v121_v53  ;;  %v3586_v63 = vld [vmem:[%s4288_s0 + $0x5] sm:$0xff] }
  0x24   :  { %1140 = vmatprep.subr.bf16.mxu0 %v2832_v31  ;;  %v2871_v31 = vld [vmem:[%s4287_s1 + $0x160] ss:$8 sps:$4 sm:$0xff]   ;;  %v3564_v52 = vld [vmem:[%s4288_s0 + $0x18] sm:$0xff]  ;;  %v2915_v10 = vld [vmem:[%s4287_s1 + $0x244] ss:$8 sps:$4 sm:$0xff]  }
  0x25   :  { %v2904_v1 = vld [vmem:[%s4287_s1 + $0x210] ss:$8 sps:$4 sm:$0xff]   ;;  %v185_v11 = vld [vmem:[%s4288_s0 + $0x1d] sm:$0x7]  ;;  %v2913_v12 = vld [vmem:[%s4287_s1 + $0x240] ss:$8 sps:$4 sm:$0xff]   ;;  %v241_v23 = vpack.c.bf16 %v3564_v52, %v3381_v37 }
  0x26   :  { %v2910_v9 = vld [vmem:[%s4287_s1 + $0x230] ss:$8 sps:$4 sm:$0xff]   ;;  %187 = vst [vmem:[#allocation2 + $0x110] sm:$0x7] %v185_v11  ;;  %v2918_v15 = vld [vmem:[%s4287_s1 + $0x254] ss:$8 sps:$4 sm:$0xff]  }
  0x27   :  { %1141 = vmatpush1.bf16.msra.mxu0 %v2834_v33  ;;  %v2874_v33 = vld [vmem:[%s4287_s1 + $0x170] ss:$8 sps:$4 sm:$0xff]   ;;  %v2942_v45 = vld [vmem:[%s4287_s1 + $0x2d4] ss:$8 sps:$4 sm:$0xff]  }
  0x28   :  { %1142 = vmatprep.subr.bf16.mxu0 %v2835_v34  ;;  %v2879_v34 = vld [vmem:[%s4287_s1 + $0x184] ss:$8 sps:$4 sm:$0xff]   ;;  %v3637_v18 = vld [vmem:[%s4288_s0 + $0x15] sm:$0xff]  ;;  %v3032_v53 = vld [vmem:[%s4289_s3 + $0x60] ss:$16 sps:$4 sm:$0xff]  }
  0x29   :  { %v2960_v14 = vld [vmem:[%s4287_s1 + $0x334] ss:$8 sps:$4 sm:$0xff]   ;;  %v3047_v11 = vld [vmem:[%s4289_s3 + $0x100] ss:$16 sps:$4 sm:$0xff]  }
  0x2a   :  { %v2958_v37 = vld [vmem:[%s4287_s1 + $0x330] ss:$8 sps:$4 sm:$0xff]   ;;  %v3048_v52 = vld [vmem:[%s4289_s3 + $0x124] ss:$16 sps:$4 sm:$0xff]  }
  0x2b   :  { %1143 = vmatpush1.bf16.msra.mxu0 %v2837_v35  ;;  %v2877_v35 = vld [vmem:[%s4287_s1 + $0x180] ss:$8 sps:$4 sm:$0xff]  }
  0x2c   :  { %1144 = vmatprep.subr.bf16.mxu0 %v2838_v36  ;;  %v2882_v36 = vld [vmem:[%s4287_s1 + $0x194] ss:$8 sps:$4 sm:$0xff]  }
  0x2f   :  { %1145 = vmatpush1.bf16.msra.mxu0 %v2840_v41  ;;  %v2888_v41 = vld [vmem:[%s4287_s1 + $0x1b4] ss:$8 sps:$4 sm:$0xff]  }
  0x30   :  { %1146 = vmatprep.subr.bf16.mxu0 %v2841_v43  ;;  %v2891_v43 = vld [vmem:[%s4287_s1 + $0x1c4] ss:$8 sps:$4 sm:$0xff]  }
  0x33   :  { %1147 = vmatpush1.bf16.msra.mxu0 %v2843_v50  ;;  %v3556_v50 = vld [vmem:[%s4288_s0 + $0x11] sm:$0xff] }
  0x34   :  { %1148 = vmatprep.subr.bf16.mxu0 %v2844_v54  ;;  %v117_v54 = vld [vmem:[%s4288_s0 + $0xb] sm:$0x1f] }
  0x35   :  { %119 = vst [vmem:[#allocation2 + $0x78] sm:$0x1f] %v117_v54  ;;  %v3033_v54 = vld [vmem:[%s4289_s3 + $0x84] ss:$16 sps:$4 sm:$0xff]  }
  0x37   :  { %1149 = vmatpush1.bf16.msra.mxu0 %v2846_v58  ;;  %v2903_v58 = vld [vmem:[%s4287_s1 + $0x204] ss:$8 sps:$4 sm:$0xff]  }
  0x38   :  { %1150 = vmatprep.subr.bf16.mxu0 %v2847_v59  ;;  %v213_v59 = vld [vmem:[#allocation2 + $0xa8] sm:$0xff] }
  0x3b   :  { %1151 = vmatpush1.bf16.msra.mxu0 %v2849_v60  ;;  %v230_v60 = vpack.c.bf16 %v3415_v57, %v194_v56  ;;  %v3594_v57 = vld [vmem:[%s4288_s0 + $0x3] sm:$0xff]  ;;  %v2946_v56 = vld [vmem:[%s4287_s1 + $0x2f0] ss:$8 sps:$4 sm:$0xff]  }
  0x3c   :  { %1152 = vmatprep.subr.bf16.mxu0 %v2850_v61  ;;  %v2901_v61 = vld [vmem:[%s4287_s1 + $0x200] ss:$8 sps:$4 sm:$0xff]  }
  0x3f   :  { %1153 = vmatpush1.bf16.msra.mxu0 %v2852_v62  ;;  %v240_v62 = vpack.c.bf16 %v3455_v13, %v213_v59  ;;  %v181_v13 = vld [vmem:[%s4288_s0 + $0x1b] sm:$0x1f]  ;;  %v3035_v59 = vld [vmem:[%s4289_s3 + $0x80] ss:$16 sps:$4 sm:$0xff]  }
  0x40   :  { %1175 = vmatprep.subr.bf16.mxu0 %v2855_v0  ;;  %v2906_v0 = vld [vmem:[%s4287_s1 + $0x214] ss:$8 sps:$4 sm:$0xff]   ;;  %183 = vst [vmem:[#allocation2 + $0x108] sm:$0x1f] %v181_v13  ;;  %v2961_v13 = vld [vmem:[%s4287_s1 + $0x340] ss:$8 sps:$4 sm:$0xff]  }
  0x42   :  { %1155 = vmatmul.mubr.bf16.vlgmr.msra.gmra.mrb[0].mxu0 %v228_v2  ;;  %v212_v2 = vld [vmem:[#allocation2 + $0xa0] sm:$0xff] }
  0x43   :  { %1176 = vmatpush1.bf16.msra.mxu0 %v2853_v3  ;;  %1164 = vmatprep.mubr.bf16.mxu0 %v238_v4  ;;  %v2909_v3 = vld [vmem:[%s4287_s1 + $0x224] ss:$8 sps:$4 sm:$0xff]   ;;  %v206_v4 = vld [vmem:[#allocation2 + $0x70] sm:$0xff] }
  0x44   :  { %1177 = vmatprep.subr.bf16.mxu0 %v2858_v5  ;;  %v239_v5 = vpack.c.bf16 %v3472_v22, %v212_v2  ;;  %v233_v7 = vpack.c.bf16 %v206_v4, %v3460_v17  ;;  %v2921_v17 = vld [vmem:[%s4287_s1 + $0x264] ss:$8 sps:$4 sm:$0xff]   ;;  %v3041_v4 = vld [vmem:[%s4289_s3 + $0xc0] ss:$16 sps:$4 sm:$0xff]  }
  0x45   :  { %v125_v22 = vld [vmem:[%s4288_s0 + $0xf] sm:$0x1]  ;;  %v3039_v2 = vld [vmem:[%s4289_s3 + $0xc4] ss:$16 sps:$4 sm:$0xff]  }
  0x46   :  { %127 = vst [vmem:[#allocation2 + $0x88] sm:$0x1] %v125_v22  ;;  %v2969_v22 = vld [vmem:[%s4287_s1 + $0x364] ss:$8 sps:$4 sm:$0xff]  }
  0x47   :  { %1178 = vmatpush1.bf16.msra.mxu0 %v2856_v6  ;;  %v2907_v6 = vld [vmem:[%s4287_s1 + $0x220] ss:$8 sps:$4 sm:$0xff]  }
  0x48   :  { %1179 = vmatprep.subr.bf16.mxu0 %v2861_v8  ;;  %v2912_v8 = vld [vmem:[%s4287_s1 + $0x234] ss:$8 sps:$4 sm:$0xff]  }
  0x4a   :  { %1165 = vmatmul.mubr.bf16.gmra.mrb[4].mxu0 %v237_v16  ;;  %v2916_v16 = vld [vmem:[%s4287_s1 + $0x250] ss:$8 sps:$4 sm:$0xff]  }
  0x4b   :  { %1180 = vmatpush1.bf16.msra.mxu0 %v2859_v19  ;;  %1207 = vmatprep.mubr.bf16.mxu0 %v231_v21  ;;  %v2919_v19 = vld [vmem:[%s4287_s1 + $0x260] ss:$8 sps:$4 sm:$0xff]   ;;  %v2924_v21 = vld [vmem:[%s4287_s1 + $0x274] ss:$8 sps:$4 sm:$0xff]  }
  0x4c   :  { %1181 = vmatprep.subr.bf16.mxu0 %v2864_v20  ;;  %v3645_v20 = vld [vmem:[%s4288_s0 + $0x13] sm:$0xff] }
  0x4f   :  { %1182 = vmatpush1.bf16.msra.mxu0 %v2862_v25  ;;  %v2922_v25 = vld [vmem:[%s4287_s1 + $0x270] ss:$8 sps:$4 sm:$0xff]  }
  0x50   :  { %1183 = vmatprep.subr.bf16.mxu0 %v2867_v26  ;;  %v2927_v26 = vld [vmem:[%s4287_s1 + $0x284] ss:$8 sps:$4 sm:$0xff]  }
  0x53   :  { %1184 = vmatpush1.bf16.msra.mxu0 %v2865_v27  ;;  %v2925_v27 = vld [vmem:[%s4287_s1 + $0x280] ss:$8 sps:$4 sm:$0xff]  }
  0x54   :  { %1185 = vmatprep.subr.bf16.mxu0 %v2870_v28  ;;  %v3665_v28 = vld [vmem:[%s4288_s0 + $0x7] sm:$0xff] }
  0x57   :  { %1186 = vmatpush1.bf16.msra.mxu0 %v2868_v29  ;;  %v189_v29 = vld [vmem:[%s4288_s0 + $0x1f] sm:$0x1] }
  0x58   :  { %1187 = vmatprep.subr.bf16.mxu0 %v2873_v30  ;;  %v2930_v30 = vld [vmem:[%s4287_s1 + $0x294] ss:$8 sps:$4 sm:$0xff]   ;;  %191 = vst [vmem:[#allocation2 + $0x118] sm:$0x1] %v189_v29 }
  0x59   :  { %v2972_v29 = vld [vmem:[%s4287_s1 + $0x374] ss:$8 sps:$4 sm:$0xff]  }
  0x5b   :  { %1188 = vmatpush1.bf16.msra.mxu0 %v2871_v31  ;;  %v2928_v31 = vld [vmem:[%s4287_s1 + $0x290] ss:$8 sps:$4 sm:$0xff]  }
  0x5c   :  { %1189 = vmatprep.subr.bf16.mxu0 %v2876_v32  ;;  %v3679_v32 = vld [vmem:[%s4288_s0 + $0x17] sm:$0xff] }
  0x5f   :  { %1190 = vmatpush1.bf16.msra.mxu0 %v2874_v33  ;;  %v2933_v33 = vld [vmem:[%s4287_s1 + $0x2a4] ss:$8 sps:$4 sm:$0xff]  }
  0x60   :  { %1191 = vmatprep.subr.bf16.mxu0 %v2879_v34  ;;  %v2931_v34 = vld [vmem:[%s4287_s1 + $0x2a0] ss:$8 sps:$4 sm:$0xff]  }
  0x63   :  { %1192 = vmatpush1.bf16.msra.mxu0 %v2877_v35  ;;  %v2936_v35 = vld [vmem:[%s4287_s1 + $0x2b4] ss:$8 sps:$4 sm:$0xff]  }
  0x64   :  { %1193 = vmatprep.subr.bf16.mxu0 %v2882_v36  ;;  %v2934_v36 = vld [vmem:[%s4287_s1 + $0x2b0] ss:$8 sps:$4 sm:$0xff]  }
  0x67   :  { %1194 = vmatpush1.bf16.msra.mxu0 %v2880_v38  ;;  %v2939_v38 = vld [vmem:[%s4287_s1 + $0x2c4] ss:$8 sps:$4 sm:$0xff]  }
  0x68   :  { %1195 = vmatprep.subr.bf16.mxu0 %v2885_v39  ;;  %v3021_v39 = vld [vmem:[%s4289_s3 + $0x4] ss:$16 sps:$4 sm:$0xff]  }
  0x69   :  { %1775 = vmatprep.subr.bf16.mxu1 %v3021_v39  ;;  %v2976_v39 = vld [vmem:[%s4287_s1 + $0x390] ss:$8 sps:$4 sm:$0xff]  }
  0x6b   :  { %1196 = vmatpush1.bf16.msra.mxu0 %v2883_v40  ;;  %v3023_v40 = vld [vmem:[%s4289_s3] ss:$16 sps:$4 sm:$0xff]  }
  0x6c   :  { %1197 = vmatprep.subr.bf16.mxu0 %v2888_v41  ;;  %v3024_v41 = vld [vmem:[%s4289_s3 + $0x24] ss:$16 sps:$4 sm:$0xff]   ;;  %1776 = vmatpush1.bf16.msra.mxu1 %v3023_v40 }
  0x6d   :  { %1777 = vmatprep.subr.bf16.mxu1 %v3024_v41  ;;  %v2981_v40 = vld [vmem:[%s4287_s1 + $0x3a4] ss:$8 sps:$4 sm:$0xff]   ;;  %v2979_v41 = vld [vmem:[%s4287_s1 + $0x3a0] ss:$8 sps:$4 sm:$0xff]  }
  0x6f   :  { %1198 = vmatpush1.bf16.msra.mxu0 %v2886_v42  ;;  %v2937_v42 = vld [vmem:[%s4287_s1 + $0x2c0] ss:$8 sps:$4 sm:$0xff]  }
  0x70   :  { %1199 = vmatprep.subr.bf16.mxu0 %v2891_v43  ;;  %v3026_v43 = vld [vmem:[%s4289_s3 + $0x20] ss:$16 sps:$4 sm:$0xff]  }
  0x71   :  { %1778 = vmatpush1.bf16.msra.mxu1 %v3026_v43  ;;  %v2982_v43 = vld [vmem:[%s4287_s1 + $0x3b0] ss:$8 sps:$4 sm:$0xff]  }
  0x73   :  { %1200 = vmatpush1.bf16.msra.mxu0 %v2889_v44  ;;  %v3027_v44 = vld [vmem:[%s4289_s3 + $0x44] ss:$16 sps:$4 sm:$0xff]  }
  0x74   :  { %1201 = vmatprep.subr.bf16.mxu0 %v2894_v46  ;;  %v2940_v46 = vld [vmem:[%s4287_s1 + $0x2d0] ss:$8 sps:$4 sm:$0xff]   ;;  %1779 = vmatprep.subr.bf16.mxu1 %v3027_v44  ;;  %v2987_v44 = vld [vmem:[%s4287_s1 + $0x3c4] ss:$8 sps:$4 sm:$0xff]  }
  0x77   :  { %1202 = vmatpush1.bf16.msra.mxu0 %v2892_v47  ;;  %v3029_v47 = vld [vmem:[%s4289_s3 + $0x40] ss:$16 sps:$4 sm:$0xff]  }
  0x78   :  { %1203 = vmatprep.subr.bf16.mxu0 %v2897_v48  ;;  %v3030_v48 = vld [vmem:[%s4289_s3 + $0x64] ss:$16 sps:$4 sm:$0xff]   ;;  %1780 = vmatpush1.bf16.msra.mxu1 %v3029_v47  ;;  %v2988_v47 = vld [vmem:[%s4287_s1 + $0x3d0] ss:$8 sps:$4 sm:$0xff]  }
  0x79   :  { %1781 = vmatprep.subr.bf16.mxu1 %v3030_v48  ;;  %v2993_v48 = vld [vmem:[%s4287_s1 + $0x3e4] ss:$8 sps:$4 sm:$0xff]  }
  0x7b   :  { %1204 = vmatpush1.bf16.msra.mxu0 %v2895_v49  ;;  %v2945_v49 = vld [vmem:[%s4287_s1 + $0x2e4] ss:$8 sps:$4 sm:$0xff]  }
  0x7c   :  { %1205 = vmatprep.subr.bf16.mxu0 %v2900_v51  ;;  %v2943_v51 = vld [vmem:[%s4287_s1 + $0x2e0] ss:$8 sps:$4 sm:$0xff]   ;;  %1782 = vmatpush1.bf16.msra.mxu1 %v3032_v53  ;;  %v2994_v53 = vld [vmem:[%s4287_s1 + $0x3f0] ss:$8 sps:$4 sm:$0xff]  }
  0x7d   :  { %1783 = vmatprep.subr.bf16.mxu1 %v3033_v54  ;;  %v207_v54 = vld [vmem:[#allocation2 + $0x78] sm:$0xff] }
  0x7f   :  { %1206 = vmatpush1.bf16.msra.mxu0 %v2898_v55  ;;  %v2948_v55 = vld [vmem:[%s4287_s1 + $0x2f4] ss:$8 sps:$4 sm:$0xff]  }
  0x80   :  { %1228 = vmatprep.subr.bf16.mxu0 %v2903_v58  ;;  %v2951_v58 = vld [vmem:[%s4287_s1 + $0x304] ss:$8 sps:$4 sm:$0xff]   ;;  %1784 = vmatpush1.bf16.msra.mxu1 %v3035_v59  ;;  %v2997_v59 = vld [vmem:[%s4287_s1 + $0x400] ss:$8 sps:$4 sm:$0xff]  }
  0x82   :  { %1208 = vmatmul.mubr.bf16.vlgmr.msra.gmra.mrb[0].mxu0 %v230_v60  ;;  %v3036_v60 = vld [vmem:[%s4289_s3 + $0xa4] ss:$16 sps:$4 sm:$0xff]  }
  0x83   :  { %1229 = vmatpush1.bf16.msra.mxu0 %v2901_v61  ;;  %1217 = vmatprep.mubr.bf16.mxu0 %v240_v62  ;;  %v224_v61 = vld [vmem:[#allocation2 + $0x100] sm:$0xff] }
  0x84   :  { %1230 = vmatprep.subr.bf16.mxu0 %v2906_v0  ;;  %v2949_v62 = vld [vmem:[%s4287_s1 + $0x300] ss:$8 sps:$4 sm:$0xff]   ;;  %1785 = vmatprep.subr.bf16.mxu1 %v3036_v60 }
  0x85   :  { %v3038_v0 = vld [vmem:[%s4289_s3 + $0xa0] ss:$16 sps:$4 sm:$0xff]  }
  0x86   :  { %1786 = vmatpush1.bf16.msra.mxu1 %v3038_v0  ;;  %v3005_v0 = vld [vmem:[%s4287_s1 + $0x424] ss:$8 sps:$4 sm:$0xff]  }
  0x87   :  { %1231 = vmatpush1.bf16.msra.mxu0 %v2904_v1  ;;  %v2954_v1 = vld [vmem:[%s4287_s1 + $0x314] ss:$8 sps:$4 sm:$0xff]   ;;  %1787 = vmatprep.subr.bf16.mxu1 %v3039_v2 }
  0x88   :  { %1232 = vmatprep.subr.bf16.mxu0 %v2909_v3  ;;  %v242_v3 = vpack.c.bf16 %v224_v61, %v3556_v50  ;;  %v2957_v50 = vld [vmem:[%s4287_s1 + $0x324] ss:$8 sps:$4 sm:$0xff]   ;;  %v3002_v61 = vld [vmem:[%s4287_s1 + $0x414] ss:$8 sps:$4 sm:$0xff]  }
  0x89   :  { %v3008_v2 = vld [vmem:[%s4287_s1 + $0x434] ss:$8 sps:$4 sm:$0xff]  }
  0x8a   :  { %1218 = vmatmul.mubr.bf16.gmra.mrb[4].mxu0 %v239_v5  ;;  %v2952_v5 = vld [vmem:[%s4287_s1 + $0x310] ss:$8 sps:$4 sm:$0xff]   ;;  %1788 = vmatpush1.bf16.msra.mxu1 %v3041_v4  ;;  %v3254_v4 = vmov 0  }
  0x8b   :  { %1233 = vmatpush1.bf16.msra.mxu0 %v2907_v6  ;;  %1260 = vmatprep.mubr.bf16.mxu0 %v233_v7  ;;  %v3042_v6 = vld [vmem:[%s4289_s3 + $0xe4] ss:$16 sps:$4 sm:$0xff]  }
  0x8c   :  { %1234 = vmatprep.subr.bf16.mxu0 %v2912_v8  ;;  %v208_v7 = vld [vmem:[#allocation2 + $0x80] sm:$0xff]  ;;  %1789 = vmatprep.subr.bf16.mxu1 %v3042_v6  ;;  %v3014_v6 = vld [vmem:[%s4287_s1 + $0x454] ss:$8 sps:$4 sm:$0xff]  }
  0x8d   :  { %v3044_v8 = vld [vmem:[%s4289_s3 + $0xe0] ss:$16 sps:$4 sm:$0xff]  }
  0x8e   :  { %1790 = vmatpush1.bf16.msra.mxu1 %v3044_v8  ;;  %v3015_v8 = vld [vmem:[%s4287_s1 + $0x460] ss:$8 sps:$4 sm:$0xff]  }
  0x8f   :  { %1235 = vmatpush1.bf16.msra.mxu0 %v2910_v9  ;;  %v2955_v9 = vld [vmem:[%s4287_s1 + $0x320] ss:$8 sps:$4 sm:$0xff]  }
  0x90   :  { %1236 = vmatprep.subr.bf16.mxu0 %v2915_v10  ;;  %v235_v10 = vpack.c.bf16 %v208_v7, %v3586_v63  ;;  %v2963_v63 = vld [vmem:[%s4287_s1 + $0x344] ss:$8 sps:$4 sm:$0xff]  }
  0x91   :  { %v3017_v7 = vld [vmem:[%s4287_s1 + $0x464] ss:$8 sps:$4 sm:$0xff]  }
  0x93   :  { %1237 = vmatpush1.bf16.msra.mxu0 %v2913_v12  ;;  %v3050_v12 = vld [vmem:[%s4289_s3 + $0x120] ss:$16 sps:$4 sm:$0xff]  }
  0x94   :  { %1238 = vmatprep.subr.bf16.mxu0 %v2918_v15  ;;  %v3051_v15 = vld [vmem:[%s4289_s3 + $0x144] ss:$16 sps:$4 sm:$0xff]  }
  0x97   :  { %1239 = vmatpush1.bf16.msra.mxu0 %v2916_v16  ;;  %v2966_v16 = vld [vmem:[%s4287_s1 + $0x354] ss:$8 sps:$4 sm:$0xff]  }
  0x98   :  { %1240 = vmatprep.subr.bf16.mxu0 %v2921_v17  ;;  %v3053_v17 = vld [vmem:[%s4289_s3 + $0x140] ss:$16 sps:$4 sm:$0xff]  }
  0x9b   :  { %1241 = vmatpush1.bf16.msra.mxu0 %v2919_v19  ;;  %v2964_v19 = vld [vmem:[%s4287_s1 + $0x350] ss:$8 sps:$4 sm:$0xff]  }
  0x9c   :  { %1242 = vmatprep.subr.bf16.mxu0 %v2924_v21  ;;  %v3054_v21 = vld [vmem:[%s4289_s3 + $0x164] ss:$16 sps:$4 sm:$0xff]  }
  0x9f   :  { %1243 = vmatpush1.bf16.msra.mxu0 %v2922_v25  ;;  %v3056_v25 = vld [vmem:[%s4289_s3 + $0x160] ss:$16 sps:$4 sm:$0xff]  }
  0xa0   :  { %1244 = vmatprep.subr.bf16.mxu0 %v2927_v26  ;;  %v2967_v26 = vld [vmem:[%s4287_s1 + $0x360] ss:$8 sps:$4 sm:$0xff]  }
  0xa3   :  { %1245 = vmatpush1.bf16.msra.mxu0 %v2925_v27  ;;  %v3057_v27 = vld [vmem:[%s4289_s3 + $0x184] ss:$16 sps:$4 sm:$0xff]  }
  0xa4   :  { %1246 = vmatprep.subr.bf16.mxu0 %v2930_v30  ;;  %v3059_v30 = vld [vmem:[%s4289_s3 + $0x180] ss:$16 sps:$4 sm:$0xff]  }
  0xa7   :  { %1247 = vmatpush1.bf16.msra.mxu0 %v2928_v31  ;;  %v2970_v31 = vld [vmem:[%s4287_s1 + $0x370] ss:$8 sps:$4 sm:$0xff]  }
  0xa8   :  { %1248 = vmatprep.subr.bf16.mxu0 %v2933_v33  ;;  %v3060_v33 = vld [vmem:[%s4289_s3 + $0x1a4] ss:$16 sps:$4 sm:$0xff]  }
  0xab   :  { %1249 = vmatpush1.bf16.msra.mxu0 %v2931_v34  ;;  %v2975_v34 = vld [vmem:[%s4287_s1 + $0x384] ss:$8 sps:$4 sm:$0xff]  }
  0xac   :  { %1250 = vmatprep.subr.bf16.mxu0 %v2936_v35  ;;  %v3062_v35 = vld [vmem:[%s4289_s3 + $0x1a0] ss:$16 sps:$4 sm:$0xff]  }
  0xaf   :  { %1251 = vmatpush1.bf16.msra.mxu0 %v2934_v36  ;;  %v2973_v36 = vld [vmem:[%s4287_s1 + $0x380] ss:$8 sps:$4 sm:$0xff]  }
  0xb0   :  { %1252 = vmatprep.subr.bf16.mxu0 %v2939_v38  ;;  %v2978_v38 = vld [vmem:[%s4287_s1 + $0x394] ss:$8 sps:$4 sm:$0xff]  }
  0xb3   :  { %1253 = vmatpush1.bf16.msra.mxu0 %v2937_v42  ;;  %v2984_v42 = vld [vmem:[%s4287_s1 + $0x3b4] ss:$8 sps:$4 sm:$0xff]  }
  0xb4   :  { %1254 = vmatprep.subr.bf16.mxu0 %v2942_v45  ;;  %v2985_v45 = vld [vmem:[%s4287_s1 + $0x3c0] ss:$8 sps:$4 sm:$0xff]  }
  0xb7   :  { %1255 = vmatpush1.bf16.msra.mxu0 %v2940_v46  ;;  %v2990_v46 = vld [vmem:[%s4287_s1 + $0x3d4] ss:$8 sps:$4 sm:$0xff]  }
  0xb8   :  { %1256 = vmatprep.subr.bf16.mxu0 %v2945_v49  ;;  %v2991_v49 = vld [vmem:[%s4287_s1 + $0x3e0] ss:$8 sps:$4 sm:$0xff]  }
  0xbb   :  { %1257 = vmatpush1.bf16.msra.mxu0 %v2943_v51  ;;  %v2996_v51 = vld [vmem:[%s4287_s1 + $0x3f4] ss:$8 sps:$4 sm:$0xff]  }
  0xbc   :  { %1258 = vmatprep.subr.bf16.mxu0 %v2948_v55  ;;  %v2999_v55 = vld [vmem:[%s4287_s1 + $0x404] ss:$8 sps:$4 sm:$0xff]  }
  0xbf   :  { %1259 = vmatpush1.bf16.msra.mxu0 %v2946_v56  ;;  %v226_v56 = vld [vmem:[#allocation2 + $0x110] sm:$0xff] }
  0xc0   :  { %1281 = vmatprep.subr.bf16.mxu0 %v2951_v58  ;;  %v234_v58 = vpack.c.bf16 %v207_v54, %v3594_v57  ;;  %v244_v60 = vpack.c.bf16 %v226_v56, %v3637_v18  ;;  %v225_v57 = vld [vmem:[#allocation2 + $0x108] sm:$0xff] }
  0xc1   :  { %v243_v18 = vpack.c.bf16 %v225_v57, %v3645_v20  ;;  %v3011_v20 = vld [vmem:[%s4287_s1 + $0x444] ss:$8 sps:$4 sm:$0xff]  }
  0xc2   :  { %1261 = vmatmul.mubr.bf16.vlgmr.msra.gmra.mrb[0].mxu0 %v232_v24  ;;  %v3045_v24 = vld [vmem:[%s4289_s3 + $0x104] ss:$16 sps:$4 sm:$0xff]   ;;  %v3080_v54 = vld [vmem:[%s4289_s3 + $0x6c] ss:$16 sps:$4 sm:$0xff]  }
  0xc3   :  { %1282 = vmatpush1.bf16.msra.mxu0 %v2949_v62  ;;  %1270 = vmatprep.mubr.bf16.mxu0 %v242_v3  ;;  %v3000_v62 = vld [vmem:[%s4287_s1 + $0x410] ss:$8 sps:$4 sm:$0xff]   ;;  %v3083_v56 = vld [vmem:[%s4289_s3 + $0x8c] ss:$16 sps:$4 sm:$0xff]  }
  0xc4   :  { %1283 = vmatprep.subr.bf16.mxu0 %v2954_v1  ;;  %1791 = vmatprep.subr.bf16.mxu1 %v3045_v24  ;;  %v3003_v1 = vld [vmem:[%s4287_s1 + $0x420] ss:$8 sps:$4 sm:$0xff]   ;;  %v3006_v3 = vld [vmem:[%s4287_s1 + $0x430] ss:$8 sps:$4 sm:$0xff]   ;;  %v3092_v57 = vld [vmem:[%s4289_s3 + $0xec] ss:$16 sps:$4 sm:$0xff]  }
  0xc5   :  { %1792 = vmatpush1.bf16.msra.mxu1 %v3047_v11 }
  0xc6   :  { %1793 = vmatprep.subr.bf16.mxu1 %v3048_v52  ;;  %v3065_v52 = vld [vmem:[%s4289_s3 + $0x1c0] ss:$16 sps:$4 sm:$0xff]  }
  0xc7   :  { %1284 = vmatpush1.bf16.msra.mxu0 %v2952_v5  ;;  %v3009_v5 = vld [vmem:[%s4287_s1 + $0x440] ss:$8 sps:$4 sm:$0xff]  }
  0xc8   :  { %1285 = vmatprep.subr.bf16.mxu0 %v2957_v50  ;;  %v3012_v50 = vld [vmem:[%s4287_s1 + $0x450] ss:$8 sps:$4 sm:$0xff]  }
  0xc9   :  { %1794 = vmatpush1.bf16.msra.mxu1 %v3050_v12  ;;  %v392_v12 = vlaneseq }
  0xca   :  { %1271 = vmatmul.mubr.bf16.gmra.mrb[4].mxu0 %v241_v23  ;;  %1795 = vmatprep.subr.bf16.mxu1 %v3051_v15  ;;  %v209_v23 = vld [vmem:[#allocation2 + $0x88] sm:$0xff] }
  0xcb   :  { %1286 = vmatpush1.bf16.msra.mxu0 %v2955_v9  ;;  %1313 = vmatprep.mubr.bf16.mxu0 %v235_v10  ;;  %v3020_v9 = vld [vmem:[%s4287_s1 + $0x474] ss:$8 sps:$4 sm:$0xff]   ;;  %v236_v24 = vpack.c.bf16 %v209_v23, %v3665_v28  ;;  %v3111_v23 = vld [vmem:[%s4289_s3 + $0x1c8] ss:$16 sps:$4 sm:$0xff]  }
  0xcc   :  { %1287 = vmatprep.subr.bf16.mxu0 %v2960_v14  ;;  %v3018_v14 = vld [vmem:[%s4287_s1 + $0x470] ss:$8 sps:$4 sm:$0xff]   ;;  %v3066_v28 = vld [vmem:[%s4289_s3 + $0x1e4] ss:$16 sps:$4 sm:$0xff]  }
  0xcd   :  { %1796 = vmatpush1.bf16.msra.mxu1 %v3053_v17  ;;  %v227_v10 = vld [vmem:[#allocation2 + $0x118] sm:$0xff] }
  0xce   :  { %1797 = vmatprep.subr.bf16.mxu1 %v3054_v21  ;;  %v245_v11 = vpack.c.bf16 %v227_v10, %v3679_v32  ;;  %v3071_v32 = vld [vmem:[%s4289_s3 + $0xc] ss:$16 sps:$4 sm:$0xff]   ;;  %v3114_v10 = vld [vmem:[%s4289_s3 + $0x1e8] ss:$16 sps:$4 sm:$0xff]  }
  0xcf   :  { %1288 = vmatpush1.bf16.msra.mxu0 %v2958_v37  ;;  %v3063_v37 = vld [vmem:[%s4289_s3 + $0x1c4] ss:$16 sps:$4 sm:$0xff]  }
  0xd0   :  { %1289 = vmatprep.subr.bf16.mxu0 %v2963_v63  ;;  %v3068_v63 = vld [vmem:[%s4289_s3 + $0x1e0] ss:$16 sps:$4 sm:$0xff]  }
  0xd1   :  { %1798 = vmatpush1.bf16.msra.mxu1 %v3056_v25 }
  0xd2   :  { %1799 = vmatprep.subr.bf16.mxu1 %v3057_v27 }
  0xd3   :  { %1290 = vmatpush1.bf16.msra.mxu0 %v2961_v13  ;;  %v393_v13 = vshrl.u32 %v392_v12, 7  ;;  %v3128_v12 = vld [vmem:[%s4290_s4 + $0x34] ss:$8 sps:$4 sm:$0xff]  }
  0xd4   :  { %1291 = vmatprep.subr.bf16.mxu0 %v2966_v16  ;;  %v390_v16 = vld [vmem:[%s4291_s2] sm:$0x3] }
  0xd5   :  { %1800 = vmatpush1.bf16.msra.mxu1 %v3059_v30  ;;  %v394_v15 = vsub.s32 0, %v393_v13  ;;  %v398_v17 = vsub.s32 1, %v393_v13  ;;  %v3126_v13 = vld [vmem:[%s4290_s4 + $0x30] ss:$8 sps:$4 sm:$0xff]  }
  0xd6   :  { %1801 = vmatprep.subr.bf16.mxu1 %v3060_v33 }
  0xd7   :  { %1292 = vmatpush1.bf16.msra.mxu0 %v2964_v19  ;;  %v395_v19 = vrot.slane %v390_v16, %v394_v15  ;;  %v3131_v15 = vld [vmem:[%s4290_s4 + $0x44] ss:$8 sps:$4 sm:$0xff]  }
  0xd8   :  { %1293 = vmatprep.subr.bf16.mxu0 %v2969_v22  ;;  %v399_v22 = vrot.slane %v390_v16, %v398_v17  ;;  %v3129_v16 = vld [vmem:[%s4290_s4 + $0x40] ss:$8 sps:$4 sm:$0xff]   ;;  %v3134_v17 = vld [vmem:[%s4290_s4 + $0x54] ss:$8 sps:$4 sm:$0xff]  }
  0xd9   :  { %1802 = vmatpush1.bf16.msra.mxu1 %v3062_v35 }
  0xda   :  { %1803 = vmatprep.subr.bf16.mxu1 %v3063_v37  ;;  %v3117_v37 = vld [vmem:[%s4290_s4] ss:$8 sps:$4 sm:$0xff]  }
  0xdb   :  { %1294 = vmatpush1.bf16.msra.mxu0 %v2967_v26 }
  0xdc   :  { %1295 = vmatprep.subr.bf16.mxu0 %v2972_v29 }
  0xdd   :  { %1804 = vmatpush1.bf16.msra.mxu1 %v3065_v52  ;;  %v3122_v52 = vld [vmem:[%s4290_s4 + $0x14] ss:$8 sps:$4 sm:$0xff]  }
  0xde   :  { %1805 = vmatprep.subr.bf16.mxu1 %v3066_v28  ;;  %v3120_v28 = vld [vmem:[%s4290_s4 + $0x10] ss:$8 sps:$4 sm:$0xff]  }
  0xdf   :  { %1296 = vmatpush1.bf16.msra.mxu0 %v2970_v31 }
  0xe0   :  { %1297 = vmatprep.subr.bf16.mxu0 %v2975_v34 }
  0xe1   :  { %1806 = vmatpush1.bf16.msra.mxu1 %v3068_v63  ;;  %v3125_v63 = vld [vmem:[%s4290_s4 + $0x24] ss:$8 sps:$4 sm:$0xff]  }
  0xe2   :  { %1828 = vmatprep.subr.bf16.mxu1 %v3071_v32  ;;  %v3123_v32 = vld [vmem:[%s4290_s4 + $0x20] ss:$8 sps:$4 sm:$0xff]  }
  0xe3   :  { %1298 = vmatpush1.bf16.msra.mxu0 %v2973_v36  ;;  %v3069_v36 = vld [vmem:[%s4289_s3 + $0x8] ss:$16 sps:$4 sm:$0xff]  }
  0xe4   :  { %1299 = vmatprep.subr.bf16.mxu0 %v2978_v38  ;;  %v3074_v38 = vld [vmem:[%s4289_s3 + $0x2c] ss:$16 sps:$4 sm:$0xff]  }
  0xe7   :  { %1300 = vmatpush1.bf16.msra.mxu0 %v2976_v39 }
  0xe8   :  { %1301 = vmatprep.subr.bf16.mxu0 %v2981_v40 }
  0xeb   :  { %1302 = vmatpush1.bf16.msra.mxu0 %v2979_v41 }
  0xec   :  { %1303 = vmatprep.subr.bf16.mxu0 %v2984_v42  ;;  %v3072_v42 = vld [vmem:[%s4289_s3 + $0x28] ss:$16 sps:$4 sm:$0xff]  }
  0xef   :  { %1304 = vmatpush1.bf16.msra.mxu0 %v2982_v43 }
  0xf0   :  { %1305 = vmatprep.subr.bf16.mxu0 %v2987_v44 }
  0xf3   :  { %1306 = vmatpush1.bf16.msra.mxu0 %v2985_v45 }
  0xf4   :  { %1307 = vmatprep.subr.bf16.mxu0 %v2990_v46  ;;  %v3077_v46 = vld [vmem:[%s4289_s3 + $0x4c] ss:$16 sps:$4 sm:$0xff]  }
  0xf7   :  { %1308 = vmatpush1.bf16.msra.mxu0 %v2988_v47 }
  0xf8   :  { %1309 = vmatprep.subr.bf16.mxu0 %v2993_v48 }
  0xfb   :  { %1310 = vmatpush1.bf16.msra.mxu0 %v2991_v49 }
  0xfc   :  { %1311 = vmatprep.subr.bf16.mxu0 %v2996_v51 }
  0xff   :  { %1312 = vmatpush1.bf16.msra.mxu0 %v2994_v53  ;;  %v3075_v53 = vld [vmem:[%s4289_s3 + $0x48] ss:$16 sps:$4 sm:$0xff]  }
 0x100   :  { %1334 = vmatprep.subr.bf16.mxu0 %v2999_v55  ;;  %v3078_v55 = vld [vmem:[%s4289_s3 + $0x68] ss:$16 sps:$4 sm:$0xff]  }
 0x102   :  { %1314 = vmatmul.mubr.bf16.vlgmr.msra.gmra.mrb[0].mxu0 %v234_v58  ;;  %v3081_v58 = vld [vmem:[%s4289_s3 + $0x88] ss:$16 sps:$4 sm:$0xff]  }
 0x103   :  { %1335 = vmatpush1.bf16.msra.mxu0 %v2997_v59  ;;  %1323 = vmatprep.mubr.bf16.mxu0 %v244_v60  ;;  %v3086_v59 = vld [vmem:[%s4289_s3 + $0xac] ss:$16 sps:$4 sm:$0xff]   ;;  %v3084_v60 = vld [vmem:[%s4289_s3 + $0xa8] ss:$16 sps:$4 sm:$0xff]  }
 0x104   :  { %1336 = vmatprep.subr.bf16.mxu0 %v3002_v61  ;;  %v3089_v61 = vld [vmem:[%s4289_s3 + $0xcc] ss:$16 sps:$4 sm:$0xff]  }
 0x107   :  { %1337 = vmatpush1.bf16.msra.mxu0 %v3000_v62  ;;  %v3087_v62 = vld [vmem:[%s4289_s3 + $0xc8] ss:$16 sps:$4 sm:$0xff]  }
 0x108   :  { %1338 = vmatprep.subr.bf16.mxu0 %v3005_v0  ;;  %v3090_v0 = vld [vmem:[%s4289_s3 + $0xe8] ss:$16 sps:$4 sm:$0xff]  }
 0x10a   :  { %1324 = vmatmul.mubr.bf16.gmra.mrb[4].mxu0 %v243_v18  ;;  %v3095_v18 = vld [vmem:[%s4289_s3 + $0x10c] ss:$16 sps:$4 sm:$0xff]  }
 0x10b   :  { %1339 = vmatpush1.bf16.msra.mxu0 %v3003_v1  ;;  %1366 = vmatprep.mubr.bf16.mxu0 %v3254_v4  ;;  %v3093_v1 = vld [vmem:[%s4289_s3 + $0x108] ss:$16 sps:$4 sm:$0xff]  }
 0x10c   :  { %1340 = vmatprep.subr.bf16.mxu0 %v3008_v2  ;;  %v3098_v2 = vld [vmem:[%s4289_s3 + $0x12c] ss:$16 sps:$4 sm:$0xff]  }
 0x10f   :  { %1341 = vmatpush1.bf16.msra.mxu0 %v3006_v3  ;;  %v3096_v3 = vld [vmem:[%s4289_s3 + $0x128] ss:$16 sps:$4 sm:$0xff]  }
 0x110   :  { %1342 = vmatprep.subr.bf16.mxu0 %v3011_v20  ;;  %v3099_v20 = vld [vmem:[%s4289_s3 + $0x148] ss:$16 sps:$4 sm:$0xff]  }
 0x113   :  { %1343 = vmatpush1.bf16.msra.mxu0 %v3009_v5  ;;  %v3104_v5 = vld [vmem:[%s4289_s3 + $0x16c] ss:$16 sps:$4 sm:$0xff]  }
 0x114   :  { %1344 = vmatprep.subr.bf16.mxu0 %v3014_v6  ;;  %v3102_v6 = vld [vmem:[%s4289_s3 + $0x168] ss:$16 sps:$4 sm:$0xff]  }
 0x117   :  { %1345 = vmatpush1.bf16.msra.mxu0 %v3012_v50  ;;  %v3107_v50 = vld [vmem:[%s4289_s3 + $0x18c] ss:$16 sps:$4 sm:$0xff]  }
 0x118   :  { %1346 = vmatprep.subr.bf16.mxu0 %v3017_v7  ;;  %v3105_v7 = vld [vmem:[%s4289_s3 + $0x188] ss:$16 sps:$4 sm:$0xff]  }
 0x11b   :  { %1347 = vmatpush1.bf16.msra.mxu0 %v3015_v8  ;;  %v3110_v8 = vld [vmem:[%s4289_s3 + $0x1ac] ss:$16 sps:$4 sm:$0xff]  }
 0x11c   :  { %1348 = vmatprep.subr.bf16.mxu0 %v3020_v9  ;;  %v3108_v9 = vld [vmem:[%s4289_s3 + $0x1a8] ss:$16 sps:$4 sm:$0xff]  }
 0x11f   :  { %1349 = vmatpush1.bf16.msra.mxu0 %v3018_v14  ;;  %v3113_v14 = vld [vmem:[%s4289_s3 + $0x1cc] ss:$16 sps:$4 sm:$0xff]  }
 0x122   :  { %1367 = vmatmul.mubr.bf16.vlgmr.msra.gmra.mrb[0].mxu0 %v236_v24  ;;  %v3116_v24 = vld [vmem:[%s4289_s3 + $0x1ec] ss:$16 sps:$4 sm:$0xff]  }
 0x123   :  { %1376 = vmatprep.mubr.bf16.mxu0 %v3254_v4  ;;  %v3101_v4 = vld [vmem:[%s4289_s3 + $0x14c] ss:$16 sps:$4 sm:$0xff]  }
 0x12a   :  { %1377 = vmatmul.mubr.bf16.gmra.mrb[4].mxu0 %v245_v11  ;;  %v3119_v11 = vld [vmem:[%s4290_s4 + $0x4] ss:$8 sps:$4 sm:$0xff]  }
 0x1f5   :  { %v1368_v21 = vpop.f32.mrb[0].mxu0 }
 0x1f6   :  { %v1370_v25 = vpop.f32.mrb[1].mxu0  ;;  %v2755_v27 = vadd.f32 %v1368_v21, %v395_v19  ;;  %v3137_v21 = vld [vmem:[%s4290_s4 + $0x64] ss:$8 sps:$4 sm:$0xff]  }
 0x1f7   :  { %v1372_v26 = vpop.f32.mrb[2].mxu0  ;;  %v2756_v31 = vadd.f32 %v1370_v25, %v399_v22  ;;  %v3140_v25 = vld [vmem:[%s4290_s4 + $0x74] ss:$8 sps:$4 sm:$0xff]  }
 0x1f8   :  { %v2757_v29 = vadd.f32 %v1372_v26, %v395_v19  ;;  %v1374_v30 = vpop.f32.mrb[3].mxu0  ;;  %v3138_v26 = vld [vmem:[%s4290_s4 + $0x70] ss:$8 sps:$4 sm:$0xff]  }
 0x1f9   :  { %v2758_v33 = vadd.f32 %v1374_v30, %v399_v22  ;;  %v3146_v30 = vld [vmem:[%s4290_s4 + $0x94] ss:$8 sps:$4 sm:$0xff]  }
 0x1fa   :  { %v3975_v34 = vpack.c.bf16 %v2757_v29, %v2755_v27  ;;  %v3143_v27 = vld [vmem:[%s4290_s4 + $0x84] ss:$8 sps:$4 sm:$0xff]   ;;  %v3141_v29 = vld [vmem:[%s4290_s4 + $0x80] ss:$8 sps:$4 sm:$0xff]  }
 0x1fb   :  { %v1388_v35 = vpack.c.bf16 %v2758_v33, %v2756_v31  ;;  %v3144_v31 = vld [vmem:[%s4290_s4 + $0x90] ss:$8 sps:$4 sm:$0xff]   ;;  %v3149_v33 = vld [vmem:[%s4290_s4 + $0xa4] ss:$8 sps:$4 sm:$0xff]  }
 0x1fd   :  { %v1378_v39 = vpop.f32.mrb[4].mxu0  ;;  %1807 = vmatprep.mubr.bf16.mxu1 %v1388_v35 }
 0x1fe   :  { %v1380_v40 = vpop.f32.mrb[5].mxu0  ;;  %1808 = vmatmul.mubr.bf16.vlgmr.msra.gmra.mrb[0].mxu1 %v3975_v34  ;;  %v2759_v43 = vadd.f32 %v1378_v39, %v395_v19  ;;  %v3153_v39 = vld [vmem:[%s4290_s4 + $0xc0] ss:$8 sps:$4 sm:$0xff]  }
 0x1ff   :  { %1829 = vmatpush1.bf16.msra.mxu1 %v3069_v36  ;;  %v1382_v41 = vpop.f32.mrb[6].mxu0  ;;  %v2760_v47 = vadd.f32 %v1380_v40, %v399_v22  ;;  %v3150_v36 = vld [vmem:[%s4290_s4 + $0xb0] ss:$8 sps:$4 sm:$0xff]   ;;  %v3158_v40 = vld [vmem:[%s4290_s4 + $0xd4] ss:$8 sps:$4 sm:$0xff]  }
 0x200   :  { %v2761_v44 = vadd.f32 %v1382_v41, %v395_v19  ;;  %v1384_v45 = vpop.f32.mrb[7].mxu0  ;;  %1830 = vmatprep.subr.bf16.mxu1 %v3074_v38  ;;  %v3132_v19 = vld [vmem:[%s4290_s4 + $0x50] ss:$8 sps:$4 sm:$0xff]   ;;  %v3155_v38 = vld [vmem:[%s4290_s4 + $0xc4] ss:$8 sps:$4 sm:$0xff]  }
 0x201   :  { %v2762_v48 = vadd.f32 %v1384_v45, %v399_v22  ;;  %v3135_v22 = vld [vmem:[%s4290_s4 + $0x60] ss:$8 sps:$4 sm:$0xff]   ;;  %v3156_v41 = vld [vmem:[%s4290_s4 + $0xd0] ss:$8 sps:$4 sm:$0xff]  }
 0x202   :  { %v3990_v49 = vpack.c.bf16 %v2761_v44, %v2759_v43  ;;  %v3159_v43 = vld [vmem:[%s4290_s4 + $0xe0] ss:$8 sps:$4 sm:$0xff]   ;;  %v3164_v44 = vld [vmem:[%s4290_s4 + $0xf4] ss:$8 sps:$4 sm:$0xff]   ;;  %v3162_v45 = vld [vmem:[%s4290_s4 + $0xf0] ss:$8 sps:$4 sm:$0xff]  }
 0x203   :  { %v3992_v51 = vpack.c.bf16 %v2762_v48, %v2760_v47  ;;  %1831 = vmatpush1.bf16.msra.mxu1 %v3072_v42  ;;  %v3161_v42 = vld [vmem:[%s4290_s4 + $0xe4] ss:$8 sps:$4 sm:$0xff]  }
 0x204   :  { %1832 = vmatprep.subr.bf16.mxu1 %v3077_v46  ;;  %v3167_v46 = vld [vmem:[%s4290_s4 + $0x104] ss:$8 sps:$4 sm:$0xff]  }
 0x205   :  { %1817 = vmatprep.mubr.bf16.mxu1 %v3992_v51 }
 0x206   :  { %1818 = vmatmul.mubr.bf16.gmra.mrb[4].mxu1 %v3990_v49 }
 0x207   :  { %1833 = vmatpush1.bf16.msra.mxu1 %v3075_v53  ;;  %1860 = vmatprep.mubr.bf16.mxu1 %v1388_v35  ;;  %v3152_v35 = vld [vmem:[%s4290_s4 + $0xb4] ss:$8 sps:$4 sm:$0xff]  }
 0x208   :  { %1834 = vmatprep.subr.bf16.mxu1 %v3080_v54 }
 0x20b   :  { %1835 = vmatpush1.bf16.msra.mxu1 %v3078_v55 }
 0x20c   :  { %1836 = vmatprep.subr.bf16.mxu1 %v3083_v56 }
 0x20f   :  { %1837 = vmatpush1.bf16.msra.mxu1 %v3081_v58 }
 0x210   :  { %1838 = vmatprep.subr.bf16.mxu1 %v3086_v59 }
 0x213   :  { %1839 = vmatpush1.bf16.msra.mxu1 %v3084_v60  ;;  %v3165_v60 = vld [vmem:[%s4290_s4 + $0x100] ss:$8 sps:$4 sm:$0xff]  }
 0x214   :  { %1840 = vmatprep.subr.bf16.mxu1 %v3089_v61  ;;  %v3170_v61 = vld [vmem:[%s4290_s4 + $0x114] ss:$8 sps:$4 sm:$0xff]  }
 0x217   :  { %1841 = vmatpush1.bf16.msra.mxu1 %v3087_v62 }
 0x218   :  { %1842 = vmatprep.subr.bf16.mxu1 %v3092_v57 }
 0x21b   :  { %1843 = vmatpush1.bf16.msra.mxu1 %v3090_v0 }
 0x21c   :  { %1844 = vmatprep.subr.bf16.mxu1 %v3095_v18  ;;  %v3168_v18 = vld [vmem:[%s4290_s4 + $0x110] ss:$8 sps:$4 sm:$0xff]  }
 0x21f   :  { %1845 = vmatpush1.bf16.msra.mxu1 %v3093_v1 }
 0x220   :  { %1846 = vmatprep.subr.bf16.mxu1 %v3098_v2 }
 0x223   :  { %1847 = vmatpush1.bf16.msra.mxu1 %v3096_v3 }
 0x224   :  { %1848 = vmatprep.subr.bf16.mxu1 %v3101_v4  ;;  %v3173_v4 = vld [vmem:[%s4290_s4 + $0x124] ss:$8 sps:$4 sm:$0xff]  }
 0x227   :  { %1849 = vmatpush1.bf16.msra.mxu1 %v3099_v20 }
 0x228   :  { %1850 = vmatprep.subr.bf16.mxu1 %v3104_v5 }
 0x22b   :  { %1851 = vmatpush1.bf16.msra.mxu1 %v3102_v6 }
 0x22c   :  { %1852 = vmatprep.subr.bf16.mxu1 %v3107_v50 }
 0x22f   :  { %1853 = vmatpush1.bf16.msra.mxu1 %v3105_v7  ;;  %v3171_v7 = vld [vmem:[%s4290_s4 + $0x120] ss:$8 sps:$4 sm:$0xff]  }
 0x230   :  { %1854 = vmatprep.subr.bf16.mxu1 %v3110_v8  ;;  %v3176_v8 = vld [vmem:[%s4290_s4 + $0x134] ss:$8 sps:$4 sm:$0xff]  }
 0x233   :  { %1855 = vmatpush1.bf16.msra.mxu1 %v3108_v9  ;;  %v3174_v9 = vld [vmem:[%s4290_s4 + $0x130] ss:$8 sps:$4 sm:$0xff]  }
 0x234   :  { %1856 = vmatprep.subr.bf16.mxu1 %v3113_v14  ;;  %v3179_v14 = vld [vmem:[%s4290_s4 + $0x144] ss:$8 sps:$4 sm:$0xff]  }
 0x237   :  { %1857 = vmatpush1.bf16.msra.mxu1 %v3111_v23  ;;  %v3177_v23 = vld [vmem:[%s4290_s4 + $0x140] ss:$8 sps:$4 sm:$0xff]  }
 0x238   :  { %1858 = vmatprep.subr.bf16.mxu1 %v3116_v24  ;;  %v3182_v24 = vld [vmem:[%s4290_s4 + $0x154] ss:$8 sps:$4 sm:$0xff]  }
 0x23b   :  { %1859 = vmatpush1.bf16.msra.mxu1 %v3114_v10  ;;  %v3180_v10 = vld [vmem:[%s4290_s4 + $0x150] ss:$8 sps:$4 sm:$0xff]  }
 0x23c   :  { %2289 = vmatprep.subr.bf16.mxu1 %v3119_v11  ;;  %v3185_v11 = vld [vmem:[%s4290_s4 + $0x164] ss:$8 sps:$4 sm:$0xff]  }
 0x23e   :  { %1861 = vmatmul.mubr.bf16.vlgmr.msra.gmra.mrb[8].mxu1 %v3975_v34  ;;  %v3147_v34 = vld [vmem:[%s4290_s4 + $0xa0] ss:$8 sps:$4 sm:$0xff]  }
 0x23f   :  { %1870 = vmatprep.mubr.bf16.mxu1 %v3992_v51  ;;  %2290 = vmatpush1.bf16.msra.mxu1 %v3117_v37  ;;  %v3183_v37 = vld [vmem:[%s4290_s4 + $0x160] ss:$8 sps:$4 sm:$0xff]  }
 0x240   :  { %2291 = vmatprep.subr.bf16.mxu1 %v3122_v52  ;;  %v3188_v52 = vld [vmem:[%s4290_s4 + $0x174] ss:$8 sps:$4 sm:$0xff]  }
 0x243   :  { %2292 = vmatpush1.bf16.msra.mxu1 %v3120_v28  ;;  %v3186_v28 = vld [vmem:[%s4290_s4 + $0x170] ss:$8 sps:$4 sm:$0xff]  }
 0x244   :  { %2293 = vmatprep.subr.bf16.mxu1 %v3125_v63  ;;  %v3191_v63 = vld [vmem:[%s4290_s4 + $0x184] ss:$8 sps:$4 sm:$0xff]  }
 0x246   :  { %1871 = vmatmul.mubr.bf16.gmra.mrb[12].mxu1 %v3990_v49 }
 0x247   :  { %2294 = vmatpush1.bf16.msra.mxu1 %v3123_v32  ;;  %v3189_v32 = vld [vmem:[%s4290_s4 + $0x180] ss:$8 sps:$4 sm:$0xff]  }
 0x248   :  { %2295 = vmatprep.subr.bf16.mxu1 %v3128_v12  ;;  %v3194_v12 = vld [vmem:[%s4290_s4 + $0x194] ss:$8 sps:$4 sm:$0xff]  }
 0x24b   :  { %2296 = vmatpush1.bf16.msra.mxu1 %v3126_v13  ;;  %v3192_v13 = vld [vmem:[%s4290_s4 + $0x190] ss:$8 sps:$4 sm:$0xff]  }
 0x24c   :  { %2297 = vmatprep.subr.bf16.mxu1 %v3131_v15  ;;  %v3197_v15 = vld [vmem:[%s4290_s4 + $0x1a4] ss:$8 sps:$4 sm:$0xff]  }
 0x24f   :  { %2298 = vmatpush1.bf16.msra.mxu1 %v3129_v16  ;;  %v3195_v16 = vld [vmem:[%s4290_s4 + $0x1a0] ss:$8 sps:$4 sm:$0xff]  }
 0x250   :  { %2299 = vmatprep.subr.bf16.mxu1 %v3134_v17  ;;  %v3200_v17 = vld [vmem:[%s4290_s4 + $0x1b4] ss:$8 sps:$4 sm:$0xff]  }
 0x253   :  { %2300 = vmatpush1.bf16.msra.mxu1 %v3132_v19  ;;  %v3198_v19 = vld [vmem:[%s4290_s4 + $0x1b0] ss:$8 sps:$4 sm:$0xff]  }
 0x254   :  { %2301 = vmatprep.subr.bf16.mxu1 %v3137_v21  ;;  %v3203_v21 = vld [vmem:[%s4290_s4 + $0x1c4] ss:$8 sps:$4 sm:$0xff]  }
 0x257   :  { %2302 = vmatpush1.bf16.msra.mxu1 %v3135_v22  ;;  %v3201_v22 = vld [vmem:[%s4290_s4 + $0x1c0] ss:$8 sps:$4 sm:$0xff]  }
 0x258   :  { %2303 = vmatprep.subr.bf16.mxu1 %v3140_v25  ;;  %v3206_v25 = vld [vmem:[%s4290_s4 + $0x1d4] ss:$8 sps:$4 sm:$0xff]  }
 0x25b   :  { %2304 = vmatpush1.bf16.msra.mxu1 %v3138_v26  ;;  %v3204_v26 = vld [vmem:[%s4290_s4 + $0x1d0] ss:$8 sps:$4 sm:$0xff]  }
 0x25c   :  { %2305 = vmatprep.subr.bf16.mxu1 %v3143_v27  ;;  %v3209_v27 = vld [vmem:[%s4290_s4 + $0x1e4] ss:$8 sps:$4 sm:$0xff]  }
 0x25f   :  { %2306 = vmatpush1.bf16.msra.mxu1 %v3141_v29  ;;  %v3207_v29 = vld [vmem:[%s4290_s4 + $0x1e0] ss:$8 sps:$4 sm:$0xff]  }
 0x260   :  { %2307 = vmatprep.subr.bf16.mxu1 %v3146_v30  ;;  %v3212_v30 = vld [vmem:[%s4290_s4 + $0x1f4] ss:$8 sps:$4 sm:$0xff]  }
 0x263   :  { %2308 = vmatpush1.bf16.msra.mxu1 %v3144_v31 }
 0x264   :  { %2309 = vmatprep.subr.bf16.mxu1 %v3149_v33 }
 0x267   :  { %2310 = vmatpush1.bf16.msra.mxu1 %v3147_v34 }
 0x268   :  { %2311 = vmatprep.subr.bf16.mxu1 %v3152_v35  ;;  %v3210_v35 = vld [vmem:[%s4290_s4 + $0x1f0] ss:$8 sps:$4 sm:$0xff]  }
 0x26b   :  { %2312 = vmatpush1.bf16.msra.mxu1 %v3150_v36 }
 0x26c   :  { %2313 = vmatprep.subr.bf16.mxu1 %v3155_v38 }
 0x26f   :  { %2314 = vmatpush1.bf16.msra.mxu1 %v3153_v39 }
 0x270   :  { %2315 = vmatprep.subr.bf16.mxu1 %v3158_v40 }
 0x273   :  { %2316 = vmatpush1.bf16.msra.mxu1 %v3156_v41 }
 0x274   :  { %2317 = vmatprep.subr.bf16.mxu1 %v3161_v42 }
 0x277   :  { %2318 = vmatpush1.bf16.msra.mxu1 %v3159_v43 }
 0x278   :  { %2319 = vmatprep.subr.bf16.mxu1 %v3164_v44 }
 0x27b   :  { %2320 = vmatpush1.bf16.msra.mxu1 %v3162_v45 }
 0x27c   :  { %2342 = vmatprep.subr.bf16.mxu1 %v3167_v46 }
 0x2d1   :  { %v1809_v47 = vpop.f32.mrb[0].mxu1 }
 0x2d2   :  { %v1811_v48 = vpop.f32.mrb[1].mxu1  ;;  %v1881_v51 = vmul.f32 %v1809_v47, %v1809_v47 }
 0x2d3   :  { %v1813_v49 = vpop.f32.mrb[2].mxu1  ;;  %v1882_v55 = vmul.f32 %v1811_v48, %v1811_v48 }
 0x2d4   :  { %v1885_v53 = vmul.f32 %v1813_v49, %v1813_v49  ;;  %v1815_v54 = vpop.f32.mrb[3].mxu1 }
 0x2d5   :  { %v1886_v56 = vmul.f32 %v1815_v54, %v1815_v54 }
 0x2d6   :  { %v1897_v58 = vpack.c.bf16 %v1885_v53, %v1881_v51 }
 0x2d7   :  { %v1898_v59 = vpack.c.bf16 %v1886_v56, %v1882_v55 }
 0x2d9   :  { %v1819_v62 = vpop.f32.mrb[4].mxu1  ;;  %2321 = vmatprep.mubr.bf16.mxu1 %v1898_v59 }
 0x2da   :  { %v1821_v57 = vpop.f32.mrb[5].mxu1  ;;  %2322 = vmatmul.mubr.bf16.vlgmr.msra.gmra.mrb[16].mxu1 %v1897_v58  ;;  %v1889_v1 = vmul.f32 %v1819_v62, %v1819_v62 }
 0x2db   :  { %2343 = vmatpush1.bf16.msra.mxu1 %v3165_v60  ;;  %v1823_v0 = vpop.f32.mrb[6].mxu1  ;;  %v1890_v20 = vmul.f32 %v1821_v57, %v1821_v57 }
 0x2dc   :  { %v1893_v2 = vmul.f32 %v1823_v0, %v1823_v0  ;;  %v1825_v3 = vpop.f32.mrb[7].mxu1  ;;  %2344 = vmatprep.subr.bf16.mxu1 %v3170_v61 }
 0x2dd   :  { %v1894_v5 = vmul.f32 %v1825_v3, %v1825_v3 }
 0x2de   :  { %v1901_v6 = vpack.c.bf16 %v1893_v2, %v1889_v1 }
 0x2df   :  { %v1902_v50 = vpack.c.bf16 %v1894_v5, %v1890_v20  ;;  %2345 = vmatpush1.bf16.msra.mxu1 %v3168_v18  ;;  %v2746_v20 = vld [vmem:[%s4292_s5] ss:$0 sm:$0xff] }
 0x2e0   :  { %2346 = vmatprep.subr.bf16.mxu1 %v3173_v4 }
 0x2e1   :  { %2331 = vmatprep.mubr.bf16.mxu1 %v1902_v50 }
 0x2e2   :  { %2332 = vmatmul.mubr.bf16.gmra.mrb[20].mxu1 %v1901_v6 }
 0x2e3   :  { %2347 = vmatpush1.bf16.msra.mxu1 %v3171_v7 }
 0x2e4   :  { %2348 = vmatprep.subr.bf16.mxu1 %v3176_v8 }
 0x2e7   :  { %2349 = vmatpush1.bf16.msra.mxu1 %v3174_v9 }
 0x2e8   :  { %2350 = vmatprep.subr.bf16.mxu1 %v3179_v14 }
 0x2eb   :  { %2351 = vmatpush1.bf16.msra.mxu1 %v3177_v23 }
 0x2ec   :  { %2352 = vmatprep.subr.bf16.mxu1 %v3182_v24 }
 0x2ef   :  { %2353 = vmatpush1.bf16.msra.mxu1 %v3180_v10 }
 0x2f0   :  { %2354 = vmatprep.subr.bf16.mxu1 %v3185_v11 }
 0x2f3   :  { %2355 = vmatpush1.bf16.msra.mxu1 %v3183_v37 }
 0x2f4   :  { %2356 = vmatprep.subr.bf16.mxu1 %v3188_v52 }
 0x2f7   :  { %2357 = vmatpush1.bf16.msra.mxu1 %v3186_v28 }
 0x2f8   :  { %2358 = vmatprep.subr.bf16.mxu1 %v3191_v63 }
 0x2fb   :  { %2359 = vmatpush1.bf16.msra.mxu1 %v3189_v32 }
 0x2fc   :  { %2360 = vmatprep.subr.bf16.mxu1 %v3194_v12 }
 0x2ff   :  { %2361 = vmatpush1.bf16.msra.mxu1 %v3192_v13 }
 0x300   :  { %2362 = vmatprep.subr.bf16.mxu1 %v3197_v15 }
 0x303   :  { %2363 = vmatpush1.bf16.msra.mxu1 %v3195_v16 }
 0x304   :  { %2364 = vmatprep.subr.bf16.mxu1 %v3200_v17 }
 0x307   :  { %2365 = vmatpush1.bf16.msra.mxu1 %v3198_v19 }
 0x308   :  { %2366 = vmatprep.subr.bf16.mxu1 %v3203_v21 }
 0x30b   :  { %2367 = vmatpush1.bf16.msra.mxu1 %v3201_v22 }
 0x30c   :  { %2368 = vmatprep.subr.bf16.mxu1 %v3206_v25 }
 0x30f   :  { %2369 = vmatpush1.bf16.msra.mxu1 %v3204_v26 }
 0x310   :  { %2370 = vmatprep.subr.bf16.mxu1 %v3209_v27 }
 0x311   :  { %v1862_v31 = vpop.f32.mrb[8].mxu1 }
 0x312   :  { %v1864_v33 = vpop.f32.mrb[9].mxu1  ;;  %v1883_v36 = vmul.f32 %v1862_v31, %v1862_v31 }
 0x313   :  { %v1866_v34 = vpop.f32.mrb[10].mxu1  ;;  %2371 = vmatpush1.bf16.msra.mxu1 %v3207_v29  ;;  %v1884_v40 = vmul.f32 %v1864_v33, %v1864_v33 }
 0x314   :  { %v1887_v38 = vmul.f32 %v1866_v34, %v1866_v34  ;;  %v1868_v39 = vpop.f32.mrb[11].mxu1  ;;  %2372 = vmatprep.subr.bf16.mxu1 %v3212_v30 }
 0x315   :  { %v1888_v41 = vmul.f32 %v1868_v39, %v1868_v39 }
 0x316   :  { %v1899_v42 = vpack.c.bf16 %v1887_v38, %v1883_v36 }
 0x317   :  { %v1900_v43 = vpack.c.bf16 %v1888_v41, %v1884_v40  ;;  %2373 = vmatpush1.bf16.msra.mxu1 %v3210_v35 }
 0x319   :  { %v1872_v44 = vpop.f32.mrb[12].mxu1  ;;  %2374 = vmatprep.mubr.bf16.mxu1 %v1900_v43 }
 0x31a   :  { %v1874_v45 = vpop.f32.mrb[13].mxu1  ;;  %2375 = vmatmul.mubr.bf16.vlgmr.msra.gmra.mrb[16].mxu1 %v1899_v42  ;;  %v1891_v47 = vmul.f32 %v1872_v44, %v1872_v44 }
 0x31b   :  { %v1876_v46 = vpop.f32.mrb[14].mxu1  ;;  %v1892_v51 = vmul.f32 %v1874_v45, %v1874_v45 }
 0x31c   :  { %v1895_v48 = vmul.f32 %v1876_v46, %v1876_v46  ;;  %v1878_v49 = vpop.f32.mrb[15].mxu1 }
 0x31d   :  { %v1896_v53 = vmul.f32 %v1878_v49, %v1878_v49 }
 0x31e   :  { %v1903_v54 = vpack.c.bf16 %v1895_v48, %v1891_v47 }
 0x31f   :  { %v1904_v55 = vpack.c.bf16 %v1896_v53, %v1892_v51 }
 0x321   :  { %2384 = vmatprep.mubr.bf16.mxu1 %v1904_v55 }
 0x322   :  { %2385 = vmatmul.mubr.bf16.gmra.mrb[20].mxu1 %v1903_v54 }
 0x3ed   :  { %v2376_v56 = vpop.f32.mrb[16].mxu1 }
 0x3ee   :  { %v2378_v58 = vpop.f32.mrb[17].mxu1 }
 0x3ef   :  { %v2395_v59 = vadd.f32 1e-12, %v2378_v58  ;;  %v2380_v60 = vpop.f32.mrb[18].mxu1 }
 0x3f0   :  { %v2382_v61 = vpop.f32.mrb[19].mxu1 }
 0x3f1   :  { %3213 = vrcp.f32 %v2395_v59  ;;  %v2396_v62 = vadd.f32 1e-12, %v2382_v61 }
 0x3f3   :  { %3215 = vrcp.f32 %v2396_v62 }
 0x3f5   :  { %v2386_v57 = vpop.f32.mrb[20].mxu1 }
 0x3f6   :  { %v2388_v0 = vpop.f32.mrb[21].mxu1 }
 0x3f7   :  { %v2397_v18 = vadd.f32 1e-12, %v2388_v0  ;;  %v2390_v1 = vpop.f32.mrb[22].mxu1 }
 0x3f8   :  { %v2392_v2 = vpop.f32.mrb[23].mxu1 }
 0x3f9   :  { %3217 = vrcp.f32 %v2397_v18  ;;  %v2398_v3 = vadd.f32 1e-12, %v2392_v2 }
 0x3fb   :  { %v3214_v4 = vpop.eup %3213  ;;  %3219 = vrcp.f32 %v2398_v3 }
 0x3fc   :  { %v2403_v5 = vmul.f32 %v3214_v4, %v2376_v56 }
 0x3fd   :  { %v3216_v6 = vpop.eup %3215 }
 0x3fe   :  { %v2414_v50 = vadd.f32 %v2746_v20, %v2403_v5  ;;  %v2404_v7 = vmul.f32 %v3216_v6, %v2380_v60 }
 0x400   :  { %v2747_v8 = vmul.f32 -1.442695, %v2414_v50  ;;  %v2415_v9 = vadd.f32 %v2746_v20, %v2404_v7 }
 0x402   :  { %3221 = vpow2.f32 %v2747_v8  ;;  %v2748_v14 = vmul.f32 -1.442695, %v2415_v9 }
 0x403   :  { %v3218_v23 = vpop.eup %3217 }
 0x404   :  { %3223 = vpow2.f32 %v2748_v14  ;;  %v2405_v24 = vmul.f32 %v3218_v23, %v2386_v57 }
 0x405   :  { %v3220_v10 = vpop.eup %3219 }
 0x406   :  { %v2416_v11 = vadd.f32 %v2746_v20, %v2405_v24  ;;  %v2406_v37 = vmul.f32 %v3220_v10, %v2390_v1 }
 0x408   :  { %v2749_v52 = vmul.f32 -1.442695, %v2416_v11  ;;  %v2417_v28 = vadd.f32 %v2746_v20, %v2406_v37 }
 0x40a   :  { %3225 = vpow2.f32 %v2749_v52  ;;  %v2750_v63 = vmul.f32 -1.442695, %v2417_v28 }
 0x40c   :  { %v3222_v32 = vpop.eup %3221  ;;  %3227 = vpow2.f32 %v2750_v63 }
 0x40d   :  { %v2430_v12 = vadd.f32 1.0, %v3222_v32 }
 0x40e   :  { %v3224_v13 = vpop.eup %3223 }
 0x40f   :  { %3229 = vrcp.f32 %v2430_v12  ;;  %v2431_v15 = vadd.f32 1.0, %v3224_v13 }
 0x411   :  { %3231 = vrcp.f32 %v2431_v15 }
 0x414   :  { %v3226_v16 = vpop.eup %3225 }
 0x415   :  { %v2432_v17 = vadd.f32 1.0, %v3226_v16 }
 0x416   :  { %v3228_v19 = vpop.eup %3227 }
 0x417   :  { %3233 = vrcp.f32 %v2432_v17  ;;  %v2433_v21 = vadd.f32 1.0, %v3228_v19 }
 0x419   :  { %v3230_v22 = vpop.eup %3229  ;;  %3235 = vrcp.f32 %v2433_v21 }
 0x41a   :  { %v2751_v25 = vmul.f32 -1.442695, %v3230_v22 }
 0x41b   :  { %v3232_v26 = vpop.eup %3231 }
 0x41c   :  { %3237 = vpow2.f32 %v2751_v25  ;;  %v2752_v27 = vmul.f32 -1.442695, %v3232_v26 }
 0x41e   :  { %3239 = vpow2.f32 %v2752_v27 }
 0x421   :  { %v3234_v29 = vpop.eup %3233 }
 0x422   :  { %v2753_v30 = vmul.f32 -1.442695, %v3234_v29 }
 0x423   :  { %v3236_v31 = vpop.eup %3235 }
 0x424   :  { %3241 = vpow2.f32 %v2753_v30  ;;  %v2754_v33 = vmul.f32 -1.442695, %v3236_v31 }
 0x426   :  { %v3238_v34 = vpop.eup %3237  ;;  %3243 = vpow2.f32 %v2754_v33 }
 0x427   :  { %v2454_v35 = vadd.f32 1.0, %v3238_v34 }
 0x428   :  { %v3240_v36 = vpop.eup %3239 }
 0x429   :  { %3245 = vrcp.f32 %v2454_v35  ;;  %v2455_v38 = vadd.f32 1.0, %v3240_v36 }
 0x42b   :  { %3247 = vrcp.f32 %v2455_v38 }
 0x42e   :  { %v3242_v39 = vpop.eup %3241 }
 0x42f   :  { %v2456_v40 = vadd.f32 1.0, %v3242_v39 }
 0x430   :  { %v3244_v41 = vpop.eup %3243 }
 0x431   :  { %3249 = vrcp.f32 %v2456_v40  ;;  %v2457_v42 = vadd.f32 1.0, %v3244_v41 }
 0x433   :  { %v3246_v43 = vpop.eup %3245  ;;  %3251 = vrcp.f32 %v2457_v42 }
 0x434   :  { %2466 = vst [vmem:[%s4293_s6] sm:$0xff] %v3246_v43 }
 0x435   :  { %v3248_v44 = vpop.eup %3247 }
 0x436   :  { %2467 = vst [vmem:[%s4293_s6 + $0x8] sm:$0xff] %v3248_v44 }
 0x43b   :  { %v3250_v45 = vpop.eup %3249 }
 0x43c   :  { %2468 = vst [vmem:[%s4293_s6 + $0x10] sm:$0xff] %v3250_v45 }
 0x43d   :  { %v3252_v46 = vpop.eup %3251 }
 0x43e   :  { %2469 = vst [vmem:[%s4293_s6 + $0x18] sm:$0xff] %v3252_v46 }

</bundles_post_ra>
